<compile_context>
chip_gen: v5e
topology: v5e:2x2
jax: 0.10.0
libtpu: 0.0.40
codegen_flags: <defaults>
</compile_context>

<pallas_src>
import jax
import jax.numpy as jnp
import numpy as np
from jax import lax
from jax.experimental import pallas as pl
from jax.experimental.pallas import tpu as pltpu

K = 7      # conv kernel size
PAD = 3    # conv padding
_CHUNK_BYTES = 2 * 1024 * 1024   # cap on the f32 temp of one reduction sub-chunk


def _round_up(v, m):
    return ((v + m - 1) // m) * m


def _divisor_leq(n, cap):
    """Largest divisor of n that is <= cap (>= 1)."""
    cap = max(1, min(n, cap))
    for d in range(cap, 0, -1):
        if n % d == 0:
            return d
    return 1


def _vmem_plan():
    """(vmem_limit_bytes, per-buffer input block byte target), generation-aware."""
    cap = None
    try:
        cap = getattr(pltpu.get_tpu_info(), "vmem_capacity_bytes", None)
    except Exception:
        cap = None
    if cap is not None and cap >= 100 * 1024 * 1024:      # v5e / v6e: 128 MiB VMEM
        return 80 * 1024 * 1024, 14 * 1024 * 1024
    # v7x (64 MiB VMEM) or unknown: stay conservative.
    return 44 * 1024 * 1024, 7 * 1024 * 1024


def _zshift(v, s):
    """out[..., i] = v[..., i + s] if 0 <= i + s < n else 0 (s is a static int)."""
    if s == 0:
        return v
    n = v.shape[-1]
    if abs(s) >= n:
        return jnp.zeros_like(v)
    pad = jnp.zeros(v.shape[:-1] + (abs(s),), v.dtype)
    if s > 0:
        return jnp.concatenate([v[..., s:], pad], axis=-1)
    return jnp.concatenate([pad, v[..., : n + s]], axis=-1)


def spatial_attention(x, weight, bias, *, bt=None, ct=None):
    """x: (B, C, H, W); weight: (1, 2, K, K); bias: (1,). Returns (B, 1, H, W)."""
    B, C, H, W = x.shape
    HW = H * W
    itemsize = jnp.dtype(x.dtype).itemsize
    sub = max(8, 32 // itemsize)          # sublane multiple for this dtype
    lanes = _round_up(HW, 128)

    vmem_limit, block_target = _vmem_plan()
    plan_budget = vmem_limit - 4 * 1024 * 1024

    # Batch tile: keep >= 2 steps on the "parallel" axis when B >= 2 so both
    # v7x TensorCores get work; cap at 8 to bound scratch / finalize size.
    bt_cap = min(8, B // 2) if B >= 2 else 1
    Bt = bt if bt is not None else _divisor_leq(B, bt_cap)
    assert B % Bt == 0, f"bt={Bt} must divide B={B}"

    # VMEM cost that does not depend on Ct (all padded to (8,128) tiles).
    f32_map = _round_up(Bt, 8) * lanes * 4
    fixed = (2 * f32_map                               # running sum + max scratch
             + 2 * Bt * 8 * lanes * itemsize           # output block, double-buffered
             + 2 * 8 * lanes * 4                       # edge-mask table, double-buffered
             + 18 * Bt * lanes * 4)                    # finalize temporaries / spill

    cc_cap = max(1, _CHUNK_BYTES // (Bt * lanes * 4))  # reduction sub-chunk channels

    def _padded_x_buf(d):
        return Bt * _round_up(d, sub) * lanes * itemsize

    def _total(d):
        cc = _divisor_leq(d, cc_cap)
        return 2 * _padded_x_buf(d) + Bt * _round_up(cc, 8) * lanes * 4 + fixed

    if ct is None:
        # Ct sits in the second-minor block slot, so it must be tile-aligned
        # (multiple of `sub`) or cover all of C.
        allowed = [d for d in range(1, C + 1)
                   if C % d == 0 and (d == C or d % sub == 0)]
        Ct = min(allowed)
        for d in allowed:
            if _padded_x_buf(d) <= block_target and _total(d) <= plan_budget:
                Ct = max(Ct, d)
    else:
        Ct = ct
    assert C % Ct == 0, f"ct={Ct} must divide C={C}"
    assert Ct == C or Ct % sub == 0, (
        f"ct={Ct} must be a multiple of {sub} (or equal C) for a tile-aligned block")

    Cc = _divisor_leq(Ct, cc_cap)

    # Fold 1/C of the channel mean into the avg-channel taps; the kernel then
    # accumulates a raw channel sum.  SMEM table: [49 avg taps, 49 max taps].
    w_flat = jnp.concatenate([
        (weight[0, 0].astype(jnp.float32) / C).reshape(-1),
        weight[0, 1].astype(jnp.float32).reshape(-1),
    ])                                               # (2*K*K,)
    b_flat = bias.reshape(1).astype(jnp.float32)     # (1,)

    # Host-precomputed conv edge masks, one per dx offset:
    # masks[dx, i] = 1 iff column (i % W) + dx - PAD stays inside [0, W).
    cols = np.arange(HW) % W
    masks = np.stack(
        [((cols + dx - PAD >= 0) & (cols + dx - PAD < W)).astype(np.float32)
         for dx in range(K)], axis=0)                # (K, HW)
    masks = jnp.asarray(masks)

    x_flat = x.reshape(B, C, HW)                     # free: row-major contiguous

    def kernel(w_ref, b_ref, masks_ref, x_ref, o_ref, sum_ref, max_ref):
        k = pl.program_id(1)

        @pl.when(k == 0)
        def _init():
            sum_ref[...] = jnp.zeros_like(sum_ref)
            max_ref[...] = jnp.full_like(max_ref, -jnp.inf)

        # Channel-tile reduction in f32; sub-chunked so narrow dtypes never
        # materialize an f32 copy of the whole block.
        s = sum_ref[...]
        m = max_ref[...]
        for c0 in range(0, Ct, Cc):
            xc = x_ref[:, c0:c0 + Cc, :].astype(jnp.float32)   # (Bt, Cc, HW)
            s = s + jnp.sum(xc, axis=1)
            m = jnp.maximum(m, jnp.max(xc, axis=1))
        sum_ref[...] = s
        max_ref[...] = m

        @pl.when(k == pl.num_programs(1) - 1)
        def _finalize():
            avg_m = sum_ref[...]     # raw channel sum; 1/C folded into avg taps
            max_m = max_ref[...]

            # 7 column-shifted, edge-masked copies per map; conv zero padding
            # is handled by the zero-fill shifts + masks (no concat-pad).
            sa, sm = [], []
            for dx in range(K):
                msk = masks_ref[dx:dx + 1, :]                  # (1, HW)
                sa.append(msk * _zshift(avg_m, dx - PAD))
                sm.append(msk * _zshift(max_m, dx - PAD))

            acc = jnp.full((Bt, HW), b_ref[0], jnp.float32)
            for dy in range(K):
                # Two independent accumulators keep the VALU chain short.
                i0 = w_ref[dy * K] * sa[0] + w_ref[K * K + dy * K] * sm[0]
                i1 = w_ref[dy * K + 1] * sa[1] + w_ref[K * K + dy * K + 1] * sm[1]
                for dx in range(2, K):
                    wa = w_ref[dy * K + dx]
                    wm = w_ref[K * K + dy * K + dx]
                    if dx % 2 == 0:
                        i0 = i0 + wa * sa[dx] + wm * sm[dx]
                    else:
                        i1 = i1 + wa * sa[dx] + wm * sm[dx]
                acc = acc + _zshift(i0 + i1, (dy - PAD) * W)   # whole-row shift
            o_ref[:, 0, :] = jax.nn.sigmoid(acc).astype(o_ref.dtype)

    out = pl.pallas_call(
        kernel,
        out_shape=jax.ShapeDtypeStruct((B, 1, HW), x.dtype),
        grid=(B // Bt, C // Ct),
        in_specs=[
            pl.BlockSpec(memory_space=pltpu.MemorySpace.SMEM),         # conv taps
            pl.BlockSpec(memory_space=pltpu.MemorySpace.SMEM),         # bias
            pl.BlockSpec((K, HW), lambda b, k: (0, 0)),                # edge masks
            pl.BlockSpec((Bt, Ct, HW), lambda b, k: (b, k, 0)),        # x tile
        ],
        out_specs=pl.BlockSpec((Bt, 1, HW), lambda b, k: (b, 0, 0)),
        scratch_shapes=[pltpu.VMEM((Bt, HW), jnp.float32),    # running sum
                        pltpu.VMEM((Bt, HW), jnp.float32)],   # running max
        compiler_params=pltpu.CompilerParams(
            dimension_semantics=("parallel", "arbitrary"),
            vmem_limit_bytes=vmem_limit),
    )(w_flat, b_flat, masks, x_flat)

    return out.reshape(B, 1, H, W)       # free layout change


def spatial_attention_ref(x, weight, bias):
    """Pure-JAX reference (matches the PyTorch forward)."""
    avg_out = jnp.mean(x, axis=1, keepdims=True)
    max_out = jnp.max(x, axis=1, keepdims=True)
    out = jnp.concatenate([avg_out, max_out], axis=1)   # (B, 2, H, W)
    out = lax.conv_general_dilated(
        out, weight, window_strides=(1, 1), padding=((PAD, PAD), (PAD, PAD)),
        dimension_numbers=("NCHW", "OIHW", "NCHW"))
    out = out + bias.reshape(1, 1, 1, 1)
    return jax.nn.sigmoid(out)


if __name__ == "__main__":
    key = jax.random.PRNGKey(0)
    kw, kb, kx, kx2 = jax.random.split(key, 4)

    # Deterministic params (PyTorch Conv2d default: U(-1/sqrt(fan_in), +)).
    fan_in = 2 * K * K
    bound = 1.0 / (fan_in ** 0.5)
    weight = jax.random.uniform(kw, (1, 2, K, K), jnp.float32, -bound, bound)
    bias = jax.random.uniform(kb, (1,), jnp.float32, -bound, bound)

    # Primary toy shape from the module spec (single channel step, 2 batch steps).
    x = jax.random.normal(kx, (2, 4, 16, 16), dtype=jnp.float32)
    ref = spatial_attention_ref(x, weight, bias)
    out = jax.block_until_ready(spatial_attention(x, weight, bias))
    np.testing.assert_allclose(np.asarray(out), np.asarray(ref), atol=1e-5, rtol=1e-5)

    # Larger channel count with explicit tiles: exercises the multi-step
    # channel accumulation and the parallel batch axis (grid = (2, 2)).
    x2 = jax.random.normal(kx2, (2, 16, 16, 16), dtype=jnp.float32)
    ref2 = spatial_attention_ref(x2, weight, bias)
    out2 = jax.block_until_ready(spatial_attention(x2, weight, bias, bt=1, ct=8))
    np.testing.assert_allclose(np.asarray(out2), np.asarray(ref2), atol=1e-5, rtol=1e-5)

    print("KERNEL_OK")
</pallas_src>

<mosaic_0001>
module attributes {stable_mosaic.version = 11 : i64} {
  func.func @kernel(%arg0: i32, %arg1: i32, %arg2: memref<98xf32, #tpu.memory_space<smem>>, %arg3: memref<1xf32, #tpu.memory_space<smem>>, %arg4: memref<7x256xf32, #tpu.memory_space<vmem>>, %arg5: memref<1x4x256xf32, #tpu.memory_space<vmem>>, %arg6: memref<1x1x256xf32, #tpu.memory_space<vmem>>, %arg7: memref<1x256xf32, #tpu.memory_space<vmem>>, %arg8: memref<1x256xf32, #tpu.memory_space<vmem>>) attributes {dimension_semantics = [#tpu.dimension_semantics<parallel>, #tpu.dimension_semantics<arbitrary>], iteration_bounds = array<i64: 2, 1>, scalar_prefetch = 0 : i64, scratch_operands = 2 : i64, tpu.core_type = #tpu.core_type<tc>, window_params = [{transform_indices = @transform_0, window_bounds = array<i64: 98>}, {transform_indices = @transform_1, window_bounds = array<i64: 1>}, {pipeline_mode = #tpu.pipeline_mode<synchronous>, transform_indices = @transform_2, window_bounds = array<i64: 7, 256>}, {transform_indices = @transform_3, window_bounds = array<i64: 1, 4, 256>}, {transform_indices = @transform_4, window_bounds = array<i64: 1, 1, 256>}]} {
    %c0_i32 = arith.constant 0 : i32
    %0 = arith.cmpi eq, %arg1, %c0_i32 : i32
    %1 = arith.extui %0 : i1 to i32
    %c0_i32_0 = arith.constant 0 : i32
    %2 = arith.cmpi ne, %1, %c0_i32_0 : i32
    scf.if %2 {
      %cst_14 = arith.constant 0.000000e+00 : f32
      %15 = vector.broadcast %cst_14 : f32 to vector<1x256xf32>
      %c0_15 = arith.constant 0 : index
      %c0_16 = arith.constant 0 : index
      %16 = vector.load %arg7[%c0_15, %c0_16] : memref<1x256xf32, #tpu.memory_space<vmem>>, vector<1x256xf32>
      tpu.vector_store %arg7[%c0_15, %c0_16], %15 {strides = array<i32>} : memref<1x256xf32, #tpu.memory_space<vmem>>, vector<1x256xf32>,
      %cst_17 = arith.constant 0xFF800000 : f32
      %17 = vector.broadcast %cst_17 : f32 to vector<1x256xf32>
      %c0_18 = arith.constant 0 : index
      %c0_19 = arith.constant 0 : index
      %18 = vector.load %arg8[%c0_18, %c0_19] : memref<1x256xf32, #tpu.memory_space<vmem>>, vector<1x256xf32>
      tpu.vector_store %arg8[%c0_18, %c0_19], %17 {strides = array<i32>} : memref<1x256xf32, #tpu.memory_space<vmem>>, vector<1x256xf32>,
    } else {
    }
    %c0 = arith.constant 0 : index
    %c0_1 = arith.constant 0 : index
    %3 = vector.load %arg7[%c0, %c0_1] : memref<1x256xf32, #tpu.memory_space<vmem>>, vector<1x256xf32>
    %c0_2 = arith.constant 0 : index
    %c0_3 = arith.constant 0 : index
    %4 = vector.load %arg8[%c0_2, %c0_3] : memref<1x256xf32, #tpu.memory_space<vmem>>, vector<1x256xf32>
    %c0_4 = arith.constant 0 : index
    %c0_5 = arith.constant 0 : index
    %c0_6 = arith.constant 0 : index
    %5 = vector.load %arg5[%c0_4, %c0_5, %c0_6] : memref<1x4x256xf32, #tpu.memory_space<vmem>>, vector<1x4x256xf32>
    %cst = arith.constant dense<0.000000e+00> : vector<1x256xf32>
    %6 = vector.multi_reduction <add>, %5, %cst [1] : vector<1x4x256xf32> to vector<1x256xf32>
    %7 = arith.addf %3, %6 : vector<1x256xf32>
    %cst_7 = arith.constant dense<0xFF800000> : vector<1x256xf32>
    %8 = vector.multi_reduction <maximumf>, %5, %cst_7 [1] : vector<1x4x256xf32> to vector<1x256xf32>
    %9 = arith.maximumf %4, %8 : vector<1x256xf32>
    %c0_8 = arith.constant 0 : index
    %c0_9 = arith.constant 0 : index
    %10 = vector.load %arg7[%c0_8, %c0_9] : memref<1x256xf32, #tpu.memory_space<vmem>>, vector<1x256xf32>
    tpu.vector_store %arg7[%c0_8, %c0_9], %7 {strides = array<i32>} : memref<1x256xf32, #tpu.memory_space<vmem>>, vector<1x256xf32>,
    %c0_10 = arith.constant 0 : index
    %c0_11 = arith.constant 0 : index
    %11 = vector.load %arg8[%c0_10, %c0_11] : memref<1x256xf32, #tpu.memory_space<vmem>>, vector<1x256xf32>
    tpu.vector_store %arg8[%c0_10, %c0_11], %9 {strides = array<i32>} : memref<1x256xf32, #tpu.memory_space<vmem>>, vector<1x256xf32>,
    %c0_i32_12 = arith.constant 0 : i32
    %12 = arith.cmpi eq, %arg1, %c0_i32_12 : i32
    %13 = arith.extui %12 : i1 to i32
    %c0_i32_13 = arith.constant 0 : i32
    %14 = arith.cmpi ne, %13, %c0_i32_13 : i32
    scf.if %14 {
      %c0_14 = arith.constant 0 : index
      %c0_15 = arith.constant 0 : index
      %15 = vector.load %arg7[%c0_14, %c0_15] : memref<1x256xf32, #tpu.memory_space<vmem>>, vector<1x256xf32>
      %c0_16 = arith.constant 0 : index
      %c0_17 = arith.constant 0 : index
      %16 = vector.load %arg8[%c0_16, %c0_17] : memref<1x256xf32, #tpu.memory_space<vmem>>, vector<1x256xf32>
      %c0_18 = arith.constant 0 : index
      %c0_19 = arith.constant 0 : index
      %17 = vector.load %arg4[%c0_18, %c0_19] : memref<7x256xf32, #tpu.memory_space<vmem>>, vector<1x256xf32>
      %cst_20 = arith.constant 0.000000e+00 : f32
      %18 = vector.broadcast %cst_20 : f32 to vector<1x3xf32>
      %19 = vector.extract_strided_slice %15 {offsets = [0, 0], sizes = [1, 253], strides = [1, 1]} : vector<1x256xf32> to vector<1x253xf32>
      %20 = tpu.concatenate %18, %19 in 1 : vector<1x3xf32>, vector<1x253xf32> -> vector<1x256xf32>
      %21 = arith.mulf %17, %20 : vector<1x256xf32>
      %cst_21 = arith.constant 0.000000e+00 : f32
      %22 = vector.broadcast %cst_21 : f32 to vector<1x3xf32>
      %23 = vector.extract_strided_slice %16 {offsets = [0, 0], sizes = [1, 253], strides = [1, 1]} : vector<1x256xf32> to vector<1x253xf32>
      %24 = tpu.concatenate %22, %23 in 1 : vector<1x3xf32>, vector<1x253xf32> -> vector<1x256xf32>
      %25 = arith.mulf %17, %24 : vector<1x256xf32>
      %c1 = arith.constant 1 : index
      %c0_22 = arith.constant 0 : index
      %26 = vector.load %arg4[%c1, %c0_22] : memref<7x256xf32, #tpu.memory_space<vmem>>, vector<1x256xf32>
      %cst_23 = arith.constant 0.000000e+00 : f32
      %27 = vector.broadcast %cst_23 : f32 to vector<1x2xf32>
      %28 = vector.extract_strided_slice %15 {offsets = [0, 0], sizes = [1, 254], strides = [1, 1]} : vector<1x256xf32> to vector<1x254xf32>
      %29 = tpu.concatenate %27, %28 in 1 : vector<1x2xf32>, vector<1x254xf32> -> vector<1x256xf32>
      %30 = arith.mulf %26, %29 : vector<1x256xf32>
      %cst_24 = arith.constant 0.000000e+00 : f32
      %31 = vector.broadcast %cst_24 : f32 to vector<1x2xf32>
      %32 = vector.extract_strided_slice %16 {offsets = [0, 0], sizes = [1, 254], strides = [1, 1]} : vector<1x256xf32> to vector<1x254xf32>
      %33 = tpu.concatenate %31, %32 in 1 : vector<1x2xf32>, vector<1x254xf32> -> vector<1x256xf32>
      %34 = arith.mulf %26, %33 : vector<1x256xf32>
      %c2 = arith.constant 2 : index
      %c0_25 = arith.constant 0 : index
      %35 = vector.load %arg4[%c2, %c0_25] : memref<7x256xf32, #tpu.memory_space<vmem>>, vector<1x256xf32>
      %cst_26 = arith.constant 0.000000e+00 : f32
      %36 = vector.broadcast %cst_26 : f32 to vector<1x1xf32>
      %37 = vector.extract_strided_slice %15 {offsets = [0, 0], sizes = [1, 255], strides = [1, 1]} : vector<1x256xf32> to vector<1x255xf32>
      %38 = tpu.concatenate %36, %37 in 1 : vector<1x1xf32>, vector<1x255xf32> -> vector<1x256xf32>
      %39 = arith.mulf %35, %38 : vector<1x256xf32>
      %cst_27 = arith.constant 0.000000e+00 : f32
      %40 = vector.broadcast %cst_27 : f32 to vector<1x1xf32>
      %41 = vector.extract_strided_slice %16 {offsets = [0, 0], sizes = [1, 255], strides = [1, 1]} : vector<1x256xf32> to vector<1x255xf32>
      %42 = tpu.concatenate %40, %41 in 1 : vector<1x1xf32>, vector<1x255xf32> -> vector<1x256xf32>
      %43 = arith.mulf %35, %42 : vector<1x256xf32>
      %c3 = arith.constant 3 : index
      %c0_28 = arith.constant 0 : index
      %44 = vector.load %arg4[%c3, %c0_28] : memref<7x256xf32, #tpu.memory_space<vmem>>, vector<1x256xf32>
      %45 = arith.mulf %44, %15 : vector<1x256xf32>
      %46 = arith.mulf %44, %16 : vector<1x256xf32>
      %c4 = arith.constant 4 : index
      %c0_29 = arith.constant 0 : index
      %47 = vector.load %arg4[%c4, %c0_29] : memref<7x256xf32, #tpu.memory_space<vmem>>, vector<1x256xf32>
      %cst_30 = arith.constant 0.000000e+00 : f32
      %48 = vector.broadcast %cst_30 : f32 to vector<1x1xf32>
      %49 = vector.extract_strided_slice %15 {offsets = [0, 1], sizes = [1, 255], strides = [1, 1]} : vector<1x256xf32> to vector<1x255xf32>
      %50 = tpu.concatenate %49, %48 in 1 : vector<1x255xf32>, vector<1x1xf32> -> vector<1x256xf32>
      %51 = arith.mulf %47, %50 : vector<1x256xf32>
      %cst_31 = arith.constant 0.000000e+00 : f32
      %52 = vector.broadcast %cst_31 : f32 to vector<1x1xf32>
      %53 = vector.extract_strided_slice %16 {offsets = [0, 1], sizes = [1, 255], strides = [1, 1]} : vector<1x256xf32> to vector<1x255xf32>
      %54 = tpu.concatenate %53, %52 in 1 : vector<1x255xf32>, vector<1x1xf32> -> vector<1x256xf32>
      %55 = arith.mulf %47, %54 : vector<1x256xf32>
      %c5 = arith.constant 5 : index
      %c0_32 = arith.constant 0 : index
      %56 = vector.load %arg4[%c5, %c0_32] : memref<7x256xf32, #tpu.memory_space<vmem>>, vector<1x256xf32>
      %cst_33 = arith.constant 0.000000e+00 : f32
      %57 = vector.broadcast %cst_33 : f32 to vector<1x2xf32>
      %58 = vector.extract_strided_slice %15 {offsets = [0, 2], sizes = [1, 254], strides = [1, 1]} : vector<1x256xf32> to vector<1x254xf32>
      %59 = tpu.concatenate %58, %57 in 1 : vector<1x254xf32>, vector<1x2xf32> -> vector<1x256xf32>
      %60 = arith.mulf %56, %59 : vector<1x256xf32>
      %cst_34 = arith.constant 0.000000e+00 : f32
      %61 = vector.broadcast %cst_34 : f32 to vector<1x2xf32>
      %62 = vector.extract_strided_slice %16 {offsets = [0, 2], sizes = [1, 254], strides = [1, 1]} : vector<1x256xf32> to vector<1x254xf32>
      %63 = tpu.concatenate %62, %61 in 1 : vector<1x254xf32>, vector<1x2xf32> -> vector<1x256xf32>
      %64 = arith.mulf %56, %63 : vector<1x256xf32>
      %c6 = arith.constant 6 : index
      %c0_35 = arith.constant 0 : index
      %65 = vector.load %arg4[%c6, %c0_35] : memref<7x256xf32, #tpu.memory_space<vmem>>, vector<1x256xf32>
      %cst_36 = arith.constant 0.000000e+00 : f32
      %66 = vector.broadcast %cst_36 : f32 to vector<1x3xf32>
      %67 = vector.extract_strided_slice %15 {offsets = [0, 3], sizes = [1, 253], strides = [1, 1]} : vector<1x256xf32> to vector<1x253xf32>
      %68 = tpu.concatenate %67, %66 in 1 : vector<1x253xf32>, vector<1x3xf32> -> vector<1x256xf32>
      %69 = arith.mulf %65, %68 : vector<1x256xf32>
      %cst_37 = arith.constant 0.000000e+00 : f32
      %70 = vector.broadcast %cst_37 : f32 to vector<1x3xf32>
      %71 = vector.extract_strided_slice %16 {offsets = [0, 3], sizes = [1, 253], strides = [1, 1]} : vector<1x256xf32> to vector<1x253xf32>
      %72 = tpu.concatenate %71, %70 in 1 : vector<1x253xf32>, vector<1x3xf32> -> vector<1x256xf32>
      %73 = arith.mulf %65, %72 : vector<1x256xf32>
      %c0_38 = arith.constant 0 : index
      %74 = memref.load %arg3[%c0_38] : memref<1xf32, #tpu.memory_space<smem>>
      %75 = vector.broadcast %74 : f32 to vector<1x256xf32>
      %c0_39 = arith.constant 0 : index
      %76 = memref.load %arg2[%c0_39] : memref<98xf32, #tpu.memory_space<smem>>
      %77 = vector.broadcast %76 : f32 to vector<1x256xf32>
      %78 = arith.mulf %77, %21 : vector<1x256xf32>
      %c49 = arith.constant 49 : index
      %79 = memref.load %arg2[%c49] : memref<98xf32, #tpu.memory_space<smem>>
      %80 = vector.broadcast %79 : f32 to vector<1x256xf32>
      %81 = arith.mulf %80, %25 : vector<1x256xf32>
      %82 = arith.addf %78, %81 : vector<1x256xf32>
      %c1_40 = arith.constant 1 : index
      %83 = memref.load %arg2[%c1_40] : memref<98xf32, #tpu.memory_space<smem>>
      %84 = vector.broadcast %83 : f32 to vector<1x256xf32>
      %85 = arith.mulf %84, %30 : vector<1x256xf32>
      %c50 = arith.constant 50 : index
      %86 = memref.load %arg2[%c50] : memref<98xf32, #tpu.memory_space<smem>>
      %87 = vector.broadcast %86 : f32 to vector<1x256xf32>
      %88 = arith.mulf %87, %34 : vector<1x256xf32>
      %89 = arith.addf %85, %88 : vector<1x256xf32>
      %c2_41 = arith.constant 2 : index
      %90 = memref.load %arg2[%c2_41] : memref<98xf32, #tpu.memory_space<smem>>
      %c51 = arith.constant 51 : index
      %91 = memref.load %arg2[%c51] : memref<98xf32, #tpu.memory_space<smem>>
      %92 = vector.broadcast %90 : f32 to vector<1x256xf32>
      %93 = arith.mulf %92, %39 : vector<1x256xf32>
      %94 = arith.addf %82, %93 : vector<1x256xf32>
      %95 = vector.broadcast %91 : f32 to vector<1x256xf32>
      %96 = arith.mulf %95, %43 : vector<1x256xf32>
      %97 = arith.addf %94, %96 : vector<1x256xf32>
      %c3_42 = arith.constant 3 : index
      %98 = memref.load %arg2[%c3_42] : memref<98xf32, #tpu.memory_space<smem>>
      %c52 = arith.constant 52 : index
      %99 = memref.load %arg2[%c52] : memref<98xf32, #tpu.memory_space<smem>>
      %100 = vector.broadcast %98 : f32 to vector<1x256xf32>
      %101 = arith.mulf %100, %45 : vector<1x256xf32>
      %102 = arith.addf %89, %101 : vector<1x256xf32>
      %103 = vector.broadcast %99 : f32 to vector<1x256xf32>
      %104 = arith.mulf %103, %46 : vector<1x256xf32>
      %105 = arith.addf %102, %104 : vector<1x256xf32>
      %c4_43 = arith.constant 4 : index
      %106 = memref.load %arg2[%c4_43] : memref<98xf32, #tpu.memory_space<smem>>
      %c53 = arith.constant 53 : index
      %107 = memref.load %arg2[%c53] : memref<98xf32, #tpu.memory_space<smem>>
      %108 = vector.broadcast %106 : f32 to vector<1x256xf32>
      %109 = arith.mulf %108, %51 : vector<1x256xf32>
      %110 = arith.addf %97, %109 : vector<1x256xf32>
      %111 = vector.broadcast %107 : f32 to vector<1x256xf32>
      %112 = arith.mulf %111, %55 : vector<1x256xf32>
      %113 = arith.addf %110, %112 : vector<1x256xf32>
      %c5_44 = arith.constant 5 : index
      %114 = memref.load %arg2[%c5_44] : memref<98xf32, #tpu.memory_space<smem>>
      %c54 = arith.constant 54 : index
      %115 = memref.load %arg2[%c54] : memref<98xf32, #tpu.memory_space<smem>>
      %116 = vector.broadcast %114 : f32 to vector<1x256xf32>
      %117 = arith.mulf %116, %60 : vector<1x256xf32>
      %118 = arith.addf %105, %117 : vector<1x256xf32>
      %119 = vector.broadcast %115 : f32 to vector<1x256xf32>
      %120 = arith.mulf %119, %64 : vector<1x256xf32>
      %121 = arith.addf %118, %120 : vector<1x256xf32>
      %c6_45 = arith.constant 6 : index
      %122 = memref.load %arg2[%c6_45] : memref<98xf32, #tpu.memory_space<smem>>
      %c55 = arith.constant 55 : index
      %123 = memref.load %arg2[%c55] : memref<98xf32, #tpu.memory_space<smem>>
      %124 = vector.broadcast %122 : f32 to vector<1x256xf32>
      %125 = arith.mulf %124, %69 : vector<1x256xf32>
      %126 = arith.addf %113, %125 : vector<1x256xf32>
      %127 = vector.broadcast %123 : f32 to vector<1x256xf32>
      %128 = arith.mulf %127, %73 : vector<1x256xf32>
      %129 = arith.addf %126, %128 : vector<1x256xf32>
      %130 = arith.addf %129, %121 : vector<1x256xf32>
      %cst_46 = arith.constant 0.000000e+00 : f32
      %131 = vector.broadcast %cst_46 : f32 to vector<1x48xf32>
      %132 = vector.extract_strided_slice %130 {offsets = [0, 0], sizes = [1, 208], strides = [1, 1]} : vector<1x256xf32> to vector<1x208xf32>
      %133 = tpu.concatenate %131, %132 in 1 : vector<1x48xf32>, vector<1x208xf32> -> vector<1x256xf32>
      %134 = arith.addf %75, %133 : vector<1x256xf32>
      %c7 = arith.constant 7 : index
      %135 = memref.load %arg2[%c7] : memref<98xf32, #tpu.memory_space<smem>>
      %136 = vector.broadcast %135 : f32 to vector<1x256xf32>
      %137 = arith.mulf %136, %21 : vector<1x256xf32>
      %c56 = arith.constant 56 : index
      %138 = memref.load %arg2[%c56] : memref<98xf32, #tpu.memory_space<smem>>
      %139 = vector.broadcast %138 : f32 to vector<1x256xf32>
      %140 = arith.mulf %139, %25 : vector<1x256xf32>
      %141 = arith.addf %137, %140 : vector<1x256xf32>
      %c8 = arith.constant 8 : index
      %142 = memref.load %arg2[%c8] : memref<98xf32, #tpu.memory_space<smem>>
      %143 = vector.broadcast %142 : f32 to vector<1x256xf32>
      %144 = arith.mulf %143, %30 : vector<1x256xf32>
      %c57 = arith.constant 57 : index
      %145 = memref.load %arg2[%c57] : memref<98xf32, #tpu.memory_space<smem>>
      %146 = vector.broadcast %145 : f32 to vector<1x256xf32>
      %147 = arith.mulf %146, %34 : vector<1x256xf32>
      %148 = arith.addf %144, %147 : vector<1x256xf32>
      %c9 = arith.constant 9 : index
      %149 = memref.load %arg2[%c9] : memref<98xf32, #tpu.memory_space<smem>>
      %c58 = arith.constant 58 : index
      %150 = memref.load %arg2[%c58] : memref<98xf32, #tpu.memory_space<smem>>
      %151 = vector.broadcast %149 : f32 to vector<1x256xf32>
      %152 = arith.mulf %151, %39 : vector<1x256xf32>
      %153 = arith.addf %141, %152 : vector<1x256xf32>
      %154 = vector.broadcast %150 : f32 to vector<1x256xf32>
      %155 = arith.mulf %154, %43 : vector<1x256xf32>
      %156 = arith.addf %153, %155 : vector<1x256xf32>
      %c10 = arith.constant 10 : index
      %157 = memref.load %arg2[%c10] : memref<98xf32, #tpu.memory_space<smem>>
      %c59 = arith.constant 59 : index
      %158 = memref.load %arg2[%c59] : memref<98xf32, #tpu.memory_space<smem>>
      %159 = vector.broadcast %157 : f32 to vector<1x256xf32>
      %160 = arith.mulf %159, %45 : vector<1x256xf32>
      %161 = arith.addf %148, %160 : vector<1x256xf32>
      %162 = vector.broadcast %158 : f32 to vector<1x256xf32>
      %163 = arith.mulf %162, %46 : vector<1x256xf32>
      %164 = arith.addf %161, %163 : vector<1x256xf32>
      %c11 = arith.constant 11 : index
      %165 = memref.load %arg2[%c11] : memref<98xf32, #tpu.memory_space<smem>>
      %c60 = arith.constant 60 : index
      %166 = memref.load %arg2[%c60] : memref<98xf32, #tpu.memory_space<smem>>
      %167 = vector.broadcast %165 : f32 to vector<1x256xf32>
      %168 = arith.mulf %167, %51 : vector<1x256xf32>
      %169 = arith.addf %156, %168 : vector<1x256xf32>
      %170 = vector.broadcast %166 : f32 to vector<1x256xf32>
      %171 = arith.mulf %170, %55 : vector<1x256xf32>
      %172 = arith.addf %169, %171 : vector<1x256xf32>
      %c12 = arith.constant 12 : index
      %173 = memref.load %arg2[%c12] : memref<98xf32, #tpu.memory_space<smem>>
      %c61 = arith.constant 61 : index
      %174 = memref.load %arg2[%c61] : memref<98xf32, #tpu.memory_space<smem>>
      %175 = vector.broadcast %173 : f32 to vector<1x256xf32>
      %176 = arith.mulf %175, %60 : vector<1x256xf32>
      %177 = arith.addf %164, %176 : vector<1x256xf32>
      %178 = vector.broadcast %174 : f32 to vector<1x256xf32>
      %179 = arith.mulf %178, %64 : vector<1x256xf32>
      %180 = arith.addf %177, %179 : vector<1x256xf32>
      %c13 = arith.constant 13 : index
      %181 = memref.load %arg2[%c13] : memref<98xf32, #tpu.memory_space<smem>>
      %c62 = arith.constant 62 : index
      %182 = memref.load %arg2[%c62] : memref<98xf32, #tpu.memory_space<smem>>
      %183 = vector.broadcast %181 : f32 to vector<1x256xf32>
      %184 = arith.mulf %183, %69 : vector<1x256xf32>
      %185 = arith.addf %172, %184 : vector<1x256xf32>
      %186 = vector.broadcast %182 : f32 to vector<1x256xf32>
      %187 = arith.mulf %186, %73 : vector<1x256xf32>
      %188 = arith.addf %185, %187 : vector<1x256xf32>
      %189 = arith.addf %188, %180 : vector<1x256xf32>
      %cst_47 = arith.constant 0.000000e+00 : f32
      %190 = vector.broadcast %cst_47 : f32 to vector<1x32xf32>
      %191 = vector.extract_strided_slice %189 {offsets = [0, 0], sizes = [1, 224], strides = [1, 1]} : vector<1x256xf32> to vector<1x224xf32>
      %192 = tpu.concatenate %190, %191 in 1 : vector<1x32xf32>, vector<1x224xf32> -> vector<1x256xf32>
      %193 = arith.addf %134, %192 : vector<1x256xf32>
      %c14 = arith.constant 14 : index
      %194 = memref.load %arg2[%c14] : memref<98xf32, #tpu.memory_space<smem>>
      %195 = vector.broadcast %194 : f32 to vector<1x256xf32>
      %196 = arith.mulf %195, %21 : vector<1x256xf32>
      %c63 = arith.constant 63 : index
      %197 = memref.load %arg2[%c63] : memref<98xf32, #tpu.memory_space<smem>>
      %198 = vector.broadcast %197 : f32 to vector<1x256xf32>
      %199 = arith.mulf %198, %25 : vector<1x256xf32>
      %200 = arith.addf %196, %199 : vector<1x256xf32>
      %c15 = arith.constant 15 : index
      %201 = memref.load %arg2[%c15] : memref<98xf32, #tpu.memory_space<smem>>
      %202 = vector.broadcast %201 : f32 to vector<1x256xf32>
      %203 = arith.mulf %202, %30 : vector<1x256xf32>
      %c64 = arith.constant 64 : index
      %204 = memref.load %arg2[%c64] : memref<98xf32, #tpu.memory_space<smem>>
      %205 = vector.broadcast %204 : f32 to vector<1x256xf32>
      %206 = arith.mulf %205, %34 : vector<1x256xf32>
      %207 = arith.addf %203, %206 : vector<1x256xf32>
      %c16 = arith.constant 16 : index
      %208 = memref.load %arg2[%c16] : memref<98xf32, #tpu.memory_space<smem>>
      %c65 = arith.constant 65 : index
      %209 = memref.load %arg2[%c65] : memref<98xf32, #tpu.memory_space<smem>>
      %210 = vector.broadcast %208 : f32 to vector<1x256xf32>
      %211 = arith.mulf %210, %39 : vector<1x256xf32>
      %212 = arith.addf %200, %211 : vector<1x256xf32>
      %213 = vector.broadcast %209 : f32 to vector<1x256xf32>
      %214 = arith.mulf %213, %43 : vector<1x256xf32>
      %215 = arith.addf %212, %214 : vector<1x256xf32>
      %c17 = arith.constant 17 : index
      %216 = memref.load %arg2[%c17] : memref<98xf32, #tpu.memory_space<smem>>
      %c66 = arith.constant 66 : index
      %217 = memref.load %arg2[%c66] : memref<98xf32, #tpu.memory_space<smem>>
      %218 = vector.broadcast %216 : f32 to vector<1x256xf32>
      %219 = arith.mulf %218, %45 : vector<1x256xf32>
      %220 = arith.addf %207, %219 : vector<1x256xf32>
      %221 = vector.broadcast %217 : f32 to vector<1x256xf32>
      %222 = arith.mulf %221, %46 : vector<1x256xf32>
      %223 = arith.addf %220, %222 : vector<1x256xf32>
      %c18 = arith.constant 18 : index
      %224 = memref.load %arg2[%c18] : memref<98xf32, #tpu.memory_space<smem>>
      %c67 = arith.constant 67 : index
      %225 = memref.load %arg2[%c67] : memref<98xf32, #tpu.memory_space<smem>>
      %226 = vector.broadcast %224 : f32 to vector<1x256xf32>
      %227 = arith.mulf %226, %51 : vector<1x256xf32>
      %228 = arith.addf %215, %227 : vector<1x256xf32>
      %229 = vector.broadcast %225 : f32 to vector<1x256xf32>
      %230 = arith.mulf %229, %55 : vector<1x256xf32>
      %231 = arith.addf %228, %230 : vector<1x256xf32>
      %c19 = arith.constant 19 : index
      %232 = memref.load %arg2[%c19] : memref<98xf32, #tpu.memory_space<smem>>
      %c68 = arith.constant 68 : index
      %233 = memref.load %arg2[%c68] : memref<98xf32, #tpu.memory_space<smem>>
      %234 = vector.broadcast %232 : f32 to vector<1x256xf32>
      %235 = arith.mulf %234, %60 : vector<1x256xf32>
      %236 = arith.addf %223, %235 : vector<1x256xf32>
      %237 = vector.broadcast %233 : f32 to vector<1x256xf32>
      %238 = arith.mulf %237, %64 : vector<1x256xf32>
      %239 = arith.addf %236, %238 : vector<1x256xf32>
      %c20 = arith.constant 20 : index
      %240 = memref.load %arg2[%c20] : memref<98xf32, #tpu.memory_space<smem>>
      %c69 = arith.constant 69 : index
      %241 = memref.load %arg2[%c69] : memref<98xf32, #tpu.memory_space<smem>>
      %242 = vector.broadcast %240 : f32 to vector<1x256xf32>
      %243 = arith.mulf %242, %69 : vector<1x256xf32>
      %244 = arith.addf %231, %243 : vector<1x256xf32>
      %245 = vector.broadcast %241 : f32 to vector<1x256xf32>
      %246 = arith.mulf %245, %73 : vector<1x256xf32>
      %247 = arith.addf %244, %246 : vector<1x256xf32>
      %248 = arith.addf %247, %239 : vector<1x256xf32>
      %cst_48 = arith.constant 0.000000e+00 : f32
      %249 = vector.broadcast %cst_48 : f32 to vector<1x16xf32>
      %250 = vector.extract_strided_slice %248 {offsets = [0, 0], sizes = [1, 240], strides = [1, 1]} : vector<1x256xf32> to vector<1x240xf32>
      %251 = tpu.concatenate %249, %250 in 1 : vector<1x16xf32>, vector<1x240xf32> -> vector<1x256xf32>
      %252 = arith.addf %193, %251 : vector<1x256xf32>
      %c21 = arith.constant 21 : index
      %253 = memref.load %arg2[%c21] : memref<98xf32, #tpu.memory_space<smem>>
      %254 = vector.broadcast %253 : f32 to vector<1x256xf32>
      %255 = arith.mulf %254, %21 : vector<1x256xf32>
      %c70 = arith.constant 70 : index
      %256 = memref.load %arg2[%c70] : memref<98xf32, #tpu.memory_space<smem>>
      %257 = vector.broadcast %256 : f32 to vector<1x256xf32>
      %258 = arith.mulf %257, %25 : vector<1x256xf32>
      %259 = arith.addf %255, %258 : vector<1x256xf32>
      %c22 = arith.constant 22 : index
      %260 = memref.load %arg2[%c22] : memref<98xf32, #tpu.memory_space<smem>>
      %261 = vector.broadcast %260 : f32 to vector<1x256xf32>
      %262 = arith.mulf %261, %30 : vector<1x256xf32>
      %c71 = arith.constant 71 : index
      %263 = memref.load %arg2[%c71] : memref<98xf32, #tpu.memory_space<smem>>
      %264 = vector.broadcast %263 : f32 to vector<1x256xf32>
      %265 = arith.mulf %264, %34 : vector<1x256xf32>
      %266 = arith.addf %262, %265 : vector<1x256xf32>
      %c23 = arith.constant 23 : index
      %267 = memref.load %arg2[%c23] : memref<98xf32, #tpu.memory_space<smem>>
      %c72 = arith.constant 72 : index
      %268 = memref.load %arg2[%c72] : memref<98xf32, #tpu.memory_space<smem>>
      %269 = vector.broadcast %267 : f32 to vector<1x256xf32>
      %270 = arith.mulf %269, %39 : vector<1x256xf32>
      %271 = arith.addf %259, %270 : vector<1x256xf32>
      %272 = vector.broadcast %268 : f32 to vector<1x256xf32>
      %273 = arith.mulf %272, %43 : vector<1x256xf32>
      %274 = arith.addf %271, %273 : vector<1x256xf32>
      %c24 = arith.constant 24 : index
      %275 = memref.load %arg2[%c24] : memref<98xf32, #tpu.memory_space<smem>>
      %c73 = arith.constant 73 : index
      %276 = memref.load %arg2[%c73] : memref<98xf32, #tpu.memory_space<smem>>
      %277 = vector.broadcast %275 : f32 to vector<1x256xf32>
      %278 = arith.mulf %277, %45 : vector<1x256xf32>
      %279 = arith.addf %266, %278 : vector<1x256xf32>
      %280 = vector.broadcast %276 : f32 to vector<1x256xf32>
      %281 = arith.mulf %280, %46 : vector<1x256xf32>
      %282 = arith.addf %279, %281 : vector<1x256xf32>
      %c25 = arith.constant 25 : index
      %283 = memref.load %arg2[%c25] : memref<98xf32, #tpu.memory_space<smem>>
      %c74 = arith.constant 74 : index
      %284 = memref.load %arg2[%c74] : memref<98xf32, #tpu.memory_space<smem>>
      %285 = vector.broadcast %283 : f32 to vector<1x256xf32>
      %286 = arith.mulf %285, %51 : vector<1x256xf32>
      %287 = arith.addf %274, %286 : vector<1x256xf32>
      %288 = vector.broadcast %284 : f32 to vector<1x256xf32>
      %289 = arith.mulf %288, %55 : vector<1x256xf32>
      %290 = arith.addf %287, %289 : vector<1x256xf32>
      %c26 = arith.constant 26 : index
      %291 = memref.load %arg2[%c26] : memref<98xf32, #tpu.memory_space<smem>>
      %c75 = arith.constant 75 : index
      %292 = memref.load %arg2[%c75] : memref<98xf32, #tpu.memory_space<smem>>
      %293 = vector.broadcast %291 : f32 to vector<1x256xf32>
      %294 = arith.mulf %293, %60 : vector<1x256xf32>
      %295 = arith.addf %282, %294 : vector<1x256xf32>
      %296 = vector.broadcast %292 : f32 to vector<1x256xf32>
      %297 = arith.mulf %296, %64 : vector<1x256xf32>
      %298 = arith.addf %295, %297 : vector<1x256xf32>
      %c27 = arith.constant 27 : index
      %299 = memref.load %arg2[%c27] : memref<98xf32, #tpu.memory_space<smem>>
      %c76 = arith.constant 76 : index
      %300 = memref.load %arg2[%c76] : memref<98xf32, #tpu.memory_space<smem>>
      %301 = vector.broadcast %299 : f32 to vector<1x256xf32>
      %302 = arith.mulf %301, %69 : vector<1x256xf32>
      %303 = arith.addf %290, %302 : vector<1x256xf32>
      %304 = vector.broadcast %300 : f32 to vector<1x256xf32>
      %305 = arith.mulf %304, %73 : vector<1x256xf32>
      %306 = arith.addf %303, %305 : vector<1x256xf32>
      %307 = arith.addf %306, %298 : vector<1x256xf32>
      %308 = arith.addf %252, %307 : vector<1x256xf32>
      %c28 = arith.constant 28 : index
      %309 = memref.load %arg2[%c28] : memref<98xf32, #tpu.memory_space<smem>>
      %310 = vector.broadcast %309 : f32 to vector<1x256xf32>
      %311 = arith.mulf %310, %21 : vector<1x256xf32>
      %c77 = arith.constant 77 : index
      %312 = memref.load %arg2[%c77] : memref<98xf32, #tpu.memory_space<smem>>
      %313 = vector.broadcast %312 : f32 to vector<1x256xf32>
      %314 = arith.mulf %313, %25 : vector<1x256xf32>
      %315 = arith.addf %311, %314 : vector<1x256xf32>
      %c29 = arith.constant 29 : index
      %316 = memref.load %arg2[%c29] : memref<98xf32, #tpu.memory_space<smem>>
      %317 = vector.broadcast %316 : f32 to vector<1x256xf32>
      %318 = arith.mulf %317, %30 : vector<1x256xf32>
      %c78 = arith.constant 78 : index
      %319 = memref.load %arg2[%c78] : memref<98xf32, #tpu.memory_space<smem>>
      %320 = vector.broadcast %319 : f32 to vector<1x256xf32>
      %321 = arith.mulf %320, %34 : vector<1x256xf32>
      %322 = arith.addf %318, %321 : vector<1x256xf32>
      %c30 = arith.constant 30 : index
      %323 = memref.load %arg2[%c30] : memref<98xf32, #tpu.memory_space<smem>>
      %c79 = arith.constant 79 : index
      %324 = memref.load %arg2[%c79] : memref<98xf32, #tpu.memory_space<smem>>
      %325 = vector.broadcast %323 : f32 to vector<1x256xf32>
      %326 = arith.mulf %325, %39 : vector<1x256xf32>
      %327 = arith.addf %315, %326 : vector<1x256xf32>
      %328 = vector.broadcast %324 : f32 to vector<1x256xf32>
      %329 = arith.mulf %328, %43 : vector<1x256xf32>
      %330 = arith.addf %327, %329 : vector<1x256xf32>
      %c31 = arith.constant 31 : index
      %331 = memref.load %arg2[%c31] : memref<98xf32, #tpu.memory_space<smem>>
      %c80 = arith.constant 80 : index
      %332 = memref.load %arg2[%c80] : memref<98xf32, #tpu.memory_space<smem>>
      %333 = vector.broadcast %331 : f32 to vector<1x256xf32>
      %334 = arith.mulf %333, %45 : vector<1x256xf32>
      %335 = arith.addf %322, %334 : vector<1x256xf32>
      %336 = vector.broadcast %332 : f32 to vector<1x256xf32>
      %337 = arith.mulf %336, %46 : vector<1x256xf32>
      %338 = arith.addf %335, %337 : vector<1x256xf32>
      %c32 = arith.constant 32 : index
      %339 = memref.load %arg2[%c32] : memref<98xf32, #tpu.memory_space<smem>>
      %c81 = arith.constant 81 : index
      %340 = memref.load %arg2[%c81] : memref<98xf32, #tpu.memory_space<smem>>
      %341 = vector.broadcast %339 : f32 to vector<1x256xf32>
      %342 = arith.mulf %341, %51 : vector<1x256xf32>
      %343 = arith.addf %330, %342 : vector<1x256xf32>
      %344 = vector.broadcast %340 : f32 to vector<1x256xf32>
      %345 = arith.mulf %344, %55 : vector<1x256xf32>
      %346 = arith.addf %343, %345 : vector<1x256xf32>
      %c33 = arith.constant 33 : index
      %347 = memref.load %arg2[%c33] : memref<98xf32, #tpu.memory_space<smem>>
      %c82 = arith.constant 82 : index
      %348 = memref.load %arg2[%c82] : memref<98xf32, #tpu.memory_space<smem>>
      %349 = vector.broadcast %347 : f32 to vector<1x256xf32>
      %350 = arith.mulf %349, %60 : vector<1x256xf32>
      %351 = arith.addf %338, %350 : vector<1x256xf32>
      %352 = vector.broadcast %348 : f32 to vector<1x256xf32>
      %353 = arith.mulf %352, %64 : vector<1x256xf32>
      %354 = arith.addf %351, %353 : vector<1x256xf32>
      %c34 = arith.constant 34 : index
      %355 = memref.load %arg2[%c34] : memref<98xf32, #tpu.memory_space<smem>>
      %c83 = arith.constant 83 : index
      %356 = memref.load %arg2[%c83] : memref<98xf32, #tpu.memory_space<smem>>
      %357 = vector.broadcast %355 : f32 to vector<1x256xf32>
      %358 = arith.mulf %357, %69 : vector<1x256xf32>
      %359 = arith.addf %346, %358 : vector<1x256xf32>
      %360 = vector.broadcast %356 : f32 to vector<1x256xf32>
      %361 = arith.mulf %360, %73 : vector<1x256xf32>
      %362 = arith.addf %359, %361 : vector<1x256xf32>
      %363 = arith.addf %362, %354 : vector<1x256xf32>
      %cst_49 = arith.constant 0.000000e+00 : f32
      %364 = vector.broadcast %cst_49 : f32 to vector<1x16xf32>
      %365 = vector.extract_strided_slice %363 {offsets = [0, 16], sizes = [1, 240], strides = [1, 1]} : vector<1x256xf32> to vector<1x240xf32>
      %366 = tpu.concatenate %365, %364 in 1 : vector<1x240xf32>, vector<1x16xf32> -> vector<1x256xf32>
      %367 = arith.addf %308, %366 : vector<1x256xf32>
      %c35 = arith.constant 35 : index
      %368 = memref.load %arg2[%c35] : memref<98xf32, #tpu.memory_space<smem>>
      %369 = vector.broadcast %368 : f32 to vector<1x256xf32>
      %370 = arith.mulf %369, %21 : vector<1x256xf32>
      %c84 = arith.constant 84 : index
      %371 = memref.load %arg2[%c84] : memref<98xf32, #tpu.memory_space<smem>>
      %372 = vector.broadcast %371 : f32 to vector<1x256xf32>
      %373 = arith.mulf %372, %25 : vector<1x256xf32>
      %374 = arith.addf %370, %373 : vector<1x256xf32>
      %c36 = arith.constant 36 : index
      %375 = memref.load %arg2[%c36] : memref<98xf32, #tpu.memory_space<smem>>
      %376 = vector.broadcast %375 : f32 to vector<1x256xf32>
      %377 = arith.mulf %376, %30 : vector<1x256xf32>
      %c85 = arith.constant 85 : index
      %378 = memref.load %arg2[%c85] : memref<98xf32, #tpu.memory_space<smem>>
      %379 = vector.broadcast %378 : f32 to vector<1x256xf32>
      %380 = arith.mulf %379, %34 : vector<1x256xf32>
      %381 = arith.addf %377, %380 : vector<1x256xf32>
      %c37 = arith.constant 37 : index
      %382 = memref.load %arg2[%c37] : memref<98xf32, #tpu.memory_space<smem>>
      %c86 = arith.constant 86 : index
      %383 = memref.load %arg2[%c86] : memref<98xf32, #tpu.memory_space<smem>>
      %384 = vector.broadcast %382 : f32 to vector<1x256xf32>
      %385 = arith.mulf %384, %39 : vector<1x256xf32>
      %386 = arith.addf %374, %385 : vector<1x256xf32>
      %387 = vector.broadcast %383 : f32 to vector<1x256xf32>
      %388 = arith.mulf %387, %43 : vector<1x256xf32>
      %389 = arith.addf %386, %388 : vector<1x256xf32>
      %c38 = arith.constant 38 : index
      %390 = memref.load %arg2[%c38] : memref<98xf32, #tpu.memory_space<smem>>
      %c87 = arith.constant 87 : index
      %391 = memref.load %arg2[%c87] : memref<98xf32, #tpu.memory_space<smem>>
      %392 = vector.broadcast %390 : f32 to vector<1x256xf32>
      %393 = arith.mulf %392, %45 : vector<1x256xf32>
      %394 = arith.addf %381, %393 : vector<1x256xf32>
      %395 = vector.broadcast %391 : f32 to vector<1x256xf32>
      %396 = arith.mulf %395, %46 : vector<1x256xf32>
      %397 = arith.addf %394, %396 : vector<1x256xf32>
      %c39 = arith.constant 39 : index
      %398 = memref.load %arg2[%c39] : memref<98xf32, #tpu.memory_space<smem>>
      %c88 = arith.constant 88 : index
      %399 = memref.load %arg2[%c88] : memref<98xf32, #tpu.memory_space<smem>>
      %400 = vector.broadcast %398 : f32 to vector<1x256xf32>
      %401 = arith.mulf %400, %51 : vector<1x256xf32>
      %402 = arith.addf %389, %401 : vector<1x256xf32>
      %403 = vector.broadcast %399 : f32 to vector<1x256xf32>
      %404 = arith.mulf %403, %55 : vector<1x256xf32>
      %405 = arith.addf %402, %404 : vector<1x256xf32>
      %c40 = arith.constant 40 : index
      %406 = memref.load %arg2[%c40] : memref<98xf32, #tpu.memory_space<smem>>
      %c89 = arith.constant 89 : index
      %407 = memref.load %arg2[%c89] : memref<98xf32, #tpu.memory_space<smem>>
      %408 = vector.broadcast %406 : f32 to vector<1x256xf32>
      %409 = arith.mulf %408, %60 : vector<1x256xf32>
      %410 = arith.addf %397, %409 : vector<1x256xf32>
      %411 = vector.broadcast %407 : f32 to vector<1x256xf32>
      %412 = arith.mulf %411, %64 : vector<1x256xf32>
      %413 = arith.addf %410, %412 : vector<1x256xf32>
      %c41 = arith.constant 41 : index
      %414 = memref.load %arg2[%c41] : memref<98xf32, #tpu.memory_space<smem>>
      %c90 = arith.constant 90 : index
      %415 = memref.load %arg2[%c90] : memref<98xf32, #tpu.memory_space<smem>>
      %416 = vector.broadcast %414 : f32 to vector<1x256xf32>
      %417 = arith.mulf %416, %69 : vector<1x256xf32>
      %418 = arith.addf %405, %417 : vector<1x256xf32>
      %419 = vector.broadcast %415 : f32 to vector<1x256xf32>
      %420 = arith.mulf %419, %73 : vector<1x256xf32>
      %421 = arith.addf %418, %420 : vector<1x256xf32>
      %422 = arith.addf %421, %413 : vector<1x256xf32>
      %cst_50 = arith.constant 0.000000e+00 : f32
      %423 = vector.broadcast %cst_50 : f32 to vector<1x32xf32>
      %424 = vector.extract_strided_slice %422 {offsets = [0, 32], sizes = [1, 224], strides = [1, 1]} : vector<1x256xf32> to vector<1x224xf32>
      %425 = tpu.concatenate %424, %423 in 1 : vector<1x224xf32>, vector<1x32xf32> -> vector<1x256xf32>
      %426 = arith.addf %367, %425 : vector<1x256xf32>
      %c42 = arith.constant 42 : index
      %427 = memref.load %arg2[%c42] : memref<98xf32, #tpu.memory_space<smem>>
      %428 = vector.broadcast %427 : f32 to vector<1x256xf32>
      %429 = arith.mulf %428, %21 : vector<1x256xf32>
      %c91 = arith.constant 91 : index
      %430 = memref.load %arg2[%c91] : memref<98xf32, #tpu.memory_space<smem>>
      %431 = vector.broadcast %430 : f32 to vector<1x256xf32>
      %432 = arith.mulf %431, %25 : vector<1x256xf32>
      %433 = arith.addf %429, %432 : vector<1x256xf32>
      %c43 = arith.constant 43 : index
      %434 = memref.load %arg2[%c43] : memref<98xf32, #tpu.memory_space<smem>>
      %435 = vector.broadcast %434 : f32 to vector<1x256xf32>
      %436 = arith.mulf %435, %30 : vector<1x256xf32>
      %c92 = arith.constant 92 : index
      %437 = memref.load %arg2[%c92] : memref<98xf32, #tpu.memory_space<smem>>
      %438 = vector.broadcast %437 : f32 to vector<1x256xf32>
      %439 = arith.mulf %438, %34 : vector<1x256xf32>
      %440 = arith.addf %436, %439 : vector<1x256xf32>
      %c44 = arith.constant 44 : index
      %441 = memref.load %arg2[%c44] : memref<98xf32, #tpu.memory_space<smem>>
      %c93 = arith.constant 93 : index
      %442 = memref.load %arg2[%c93] : memref<98xf32, #tpu.memory_space<smem>>
      %443 = vector.broadcast %441 : f32 to vector<1x256xf32>
      %444 = arith.mulf %443, %39 : vector<1x256xf32>
      %445 = arith.addf %433, %444 : vector<1x256xf32>
      %446 = vector.broadcast %442 : f32 to vector<1x256xf32>
      %447 = arith.mulf %446, %43 : vector<1x256xf32>
      %448 = arith.addf %445, %447 : vector<1x256xf32>
      %c45 = arith.constant 45 : index
      %449 = memref.load %arg2[%c45] : memref<98xf32, #tpu.memory_space<smem>>
      %c94 = arith.constant 94 : index
      %450 = memref.load %arg2[%c94] : memref<98xf32, #tpu.memory_space<smem>>
      %451 = vector.broadcast %449 : f32 to vector<1x256xf32>
      %452 = arith.mulf %451, %45 : vector<1x256xf32>
      %453 = arith.addf %440, %452 : vector<1x256xf32>
      %454 = vector.broadcast %450 : f32 to vector<1x256xf32>
      %455 = arith.mulf %454, %46 : vector<1x256xf32>
      %456 = arith.addf %453, %455 : vector<1x256xf32>
      %c46 = arith.constant 46 : index
      %457 = memref.load %arg2[%c46] : memref<98xf32, #tpu.memory_space<smem>>
      %c95 = arith.constant 95 : index
      %458 = memref.load %arg2[%c95] : memref<98xf32, #tpu.memory_space<smem>>
      %459 = vector.broadcast %457 : f32 to vector<1x256xf32>
      %460 = arith.mulf %459, %51 : vector<1x256xf32>
      %461 = arith.addf %448, %460 : vector<1x256xf32>
      %462 = vector.broadcast %458 : f32 to vector<1x256xf32>
      %463 = arith.mulf %462, %55 : vector<1x256xf32>
      %464 = arith.addf %461, %463 : vector<1x256xf32>
      %c47 = arith.constant 47 : index
      %465 = memref.load %arg2[%c47] : memref<98xf32, #tpu.memory_space<smem>>
      %c96 = arith.constant 96 : index
      %466 = memref.load %arg2[%c96] : memref<98xf32, #tpu.memory_space<smem>>
      %467 = vector.broadcast %465 : f32 to vector<1x256xf32>
      %468 = arith.mulf %467, %60 : vector<1x256xf32>
      %469 = arith.addf %456, %468 : vector<1x256xf32>
      %470 = vector.broadcast %466 : f32 to vector<1x256xf32>
      %471 = arith.mulf %470, %64 : vector<1x256xf32>
      %472 = arith.addf %469, %471 : vector<1x256xf32>
      %c48 = arith.constant 48 : index
      %473 = memref.load %arg2[%c48] : memref<98xf32, #tpu.memory_space<smem>>
      %c97 = arith.constant 97 : index
      %474 = memref.load %arg2[%c97] : memref<98xf32, #tpu.memory_space<smem>>
      %475 = vector.broadcast %473 : f32 to vector<1x256xf32>
      %476 = arith.mulf %475, %69 : vector<1x256xf32>
      %477 = arith.addf %464, %476 : vector<1x256xf32>
      %478 = vector.broadcast %474 : f32 to vector<1x256xf32>
      %479 = arith.mulf %478, %73 : vector<1x256xf32>
      %480 = arith.addf %477, %479 : vector<1x256xf32>
      %481 = arith.addf %480, %472 : vector<1x256xf32>
      %cst_51 = arith.constant 0.000000e+00 : f32
      %482 = vector.broadcast %cst_51 : f32 to vector<1x48xf32>
      %483 = vector.extract_strided_slice %481 {offsets = [0, 48], sizes = [1, 208], strides = [1, 1]} : vector<1x256xf32> to vector<1x208xf32>
      %484 = tpu.concatenate %483, %482 in 1 : vector<1x208xf32>, vector<1x48xf32> -> vector<1x256xf32>
      %485 = arith.addf %426, %484 : vector<1x256xf32>
      %486 = arith.negf %485 : vector<1x256xf32>
      %487 = math.exp %486 : vector<1x256xf32>
      %cst_52 = arith.constant 1.000000e+00 : f32
      %488 = vector.broadcast %cst_52 : f32 to vector<1x256xf32>
      %489 = arith.addf %488, %487 : vector<1x256xf32>
      %490 = arith.divf %488, %489 : vector<1x256xf32>
      %c0_53 = arith.constant 0 : index
      %c0_54 = arith.constant 0 : index
      %c0_55 = arith.constant 0 : index
      %491 = vector.load %arg6[%c0_53, %c0_54, %c0_55] : memref<1x1x256xf32, #tpu.memory_space<vmem>>, vector<1x1x256xf32>
      %492 = vector.shape_cast %491 : vector<1x1x256xf32> to vector<1x256xf32>
      %493 = vector.shape_cast %490 : vector<1x256xf32> to vector<1x1x256xf32>
      tpu.vector_store %arg6[%c0_53, %c0_54, %c0_55], %493 {strides = array<i32>} : memref<1x1x256xf32, #tpu.memory_space<vmem>>, vector<1x1x256xf32>,
    } else {
    }
    return
  }
  func.func @transform_0(%arg0: i32, %arg1: i32) -> i32 {
    %c0_i32 = arith.constant 0 : i32
    %c0_i32_0 = arith.constant 0 : i32
    return %c0_i32 : i32
  }
  func.func @transform_1(%arg0: i32, %arg1: i32) -> i32 {
    %c0_i32 = arith.constant 0 : i32
    %c0_i32_0 = arith.constant 0 : i32
    return %c0_i32 : i32
  }
  func.func @transform_2(%arg0: i32, %arg1: i32) -> (i32, i32) {
    %c0_i32 = arith.constant 0 : i32
    %c0_i32_0 = arith.constant 0 : i32
    %c0_i32_1 = arith.constant 0 : i32
    return %c0_i32, %c0_i32_0 : i32, i32
  }
  func.func @transform_3(%arg0: i32, %arg1: i32) -> (i32, i32, i32) {
    %c0_i32 = arith.constant 0 : i32
    %c0_i32_0 = arith.constant 0 : i32
    return %arg0, %arg1, %c0_i32 : i32, i32, i32
  }
  func.func @transform_4(%arg0: i32, %arg1: i32) -> (i32, i32, i32) {
    %c0_i32 = arith.constant 0 : i32
    %c0_i32_0 = arith.constant 0 : i32
    %c0_i32_1 = arith.constant 0 : i32
    return %arg0, %c0_i32, %c0_i32_0 : i32, i32, i32
  }
}

</mosaic_0001>

<bundles_post_ra>
// kernel: tpu_custom_call.1
= control target key start
LH: loop header
LB: loop body
LE: loop exit
PB: predicated region body
PF: predicated region fallthrough
CT: control target
= control target key end

     0   :  { %s2521_s0 = inlined_call_operand.vmem [shape: f32[98], index: 0, kind: input, shape index: {}]   ;;  %s2522_s1 = inlined_call_operand.<no memory space> [shape: f32[1], index: 1, kind: input, shape index: {}]   ;;  %s2523_s2 = inlined_call_operand.hbm [shape: f32[7,256], index: 2, kind: input, shape index: {}]   ;;  %s2524_s3 = inlined_call_operand.hbm [shape: f32[2,4,256], index: 3, kind: input, shape index: {}]   ;;  %s2525_s4 = inlined_call_operand.hbm [shape: f32[2,1,256], index: 4, kind: output, shape index: {}]  }
   0x1   :  { %2575 = sst [smem:[#allocation69_spill]] %s2521_s0 }
   0x2   :  { %2576 = sst [smem:[#allocation70_spill]] %s2523_s2 }
   0x3   :  { %2577 = sst [smem:[#allocation71_spill]] %s2524_s3 }
   0x4   :  { %2578 = sst [smem:[#allocation72_spill]] %s2525_s4 }
   0x5   :  { %9 = sst [smem:[#allocation4]] %s2522_s1 }
   0x6   :  { %10 = vsyncpa [#allocation8], 0 }
   0x7   :  { %11 = vsyncpa [#allocation6], 0 }
   0x8   :  { %12 = vsyncpa [#allocation11], 0 }
   0x9   :  { %14 = vsyncpa [#allocation11 + $0x1], 0 }
   0xa   :  { %15 = vsyncpa [#allocation7], 0 }
   0xb   :  { %17 = vsyncpa [#allocation7 + $0x1], 0  ;;  %s1587_s17 = smov 0   ;;  %s1589_s18 = smov 0  }
   0xc   :  { %s1591_s19 = smov 0   ;;  %s1593_s20 = smov 0  }
   0xd   :  { %s1595_s21 = smov 0   ;;  %s1597_s22 = smov 0  }
   0xe LB: > { %2579 = sst [smem:[#allocation17_spill]] %s1521_s17  ;;  %s1153_s1 = sadd.s32 4294967295, %s1541_s22   ;;  %s1541_s22 = sphi %s1597_s22, %s23_s22   ;;  %s1537_s21 = sphi %s1595_s21, %s2746_s21   ;;  %s1533_s20 = sphi %s1593_s20, %s2745_s20   ;;  %s1529_s19 = sphi %s1591_s19, %s2744_s19   ;;  %s1525_s18 = sphi %s1589_s18, %s2743_s18   ;;  %s1521_s17 = sphi %s1587_s17, %s2742_s17  }
   0xf   : > { %2580 = sst [smem:[#allocation18_spill]] %s1525_s18  ;;  %s1154_s23 = sadd.s32 4294967294, %s1541_s22  }
  0x10   : > { %2581 = sst [smem:[#allocation19_spill]] %s1529_s19  ;;  %p120_p0 = scmp.ne.s32.totalorder %s1525_s18, %s1521_s17 }
  0x11   : > { %2582 = sst [smem:[#allocation20_spill]] %s1533_s20  ;;  %p1621_p1 = scmp.eq.s32.totalorder %s1153_s1, 0 }
  0x12   : > { %2583 = sst [smem:[#allocation21_spill]] %s1537_s21  ;;  %p150_p2 = scmp.eq.s32.totalorder %s1154_s23, 1 }
  0x13   : > { %2584 = sst [smem:[#allocation22_spill]] %s1541_s22  ;;  %p1627_p3 = por %p1621_p1, %p120_p0 }
  0x14   : > { %p1155_p4 = scmp.ge.s32.totalorder %s1541_s22, 1  ;;  %p1632_p5 = por %p150_p2, %p120_p0 }
  0x15   : > { %p157_p6 = scmp.lt.s32.totalorder %s1541_s22, 3  ;;  %s2589_s0 = sld [smem:[#allocation69_spill]] }
  0x16   : > { %s2587_s26 = scalar_select %p1632_p5, 1, 0 }
  0x17   : > { %p1640_p7 = pnand %p1155_p4, %p157_p6  ;;  %p1158_p8 = scmp.ge.s32.totalorder %s1541_s22, 2 }
  0x18   : > { %2588 = sst [smem:[#allocation23_spill]] %s2587_s26  ;;  %s1543_s8 = smov [#allocation9]  }
  0x19   : > { %p1283_p9 = pneg %p1640_p7  ;;  %s2591_s2 = sld [smem:[#allocation70_spill]] }
  0x1a   : > { %s184_s9 = sshll.u32 %s1543_s8, 4  ;;  %s1544_s10 = smov [#allocation5]   ;;  %s185_s9 = int_to_ptr.vmem [resolvable:$true] %s184_s9 }
  0x1b   : > { %s169_s29 = sshll.u32 %s2589_s0, 4  ;;  %p1284_p10 = pnand %p1283_p9, %p1621_p1  ;;  %s170_s29 = int_to_ptr.vmem [resolvable:$true] %s169_s29 }
  0x1c   : > { %p144_p11 = scmp.eq.s32.totalorder %s1153_s1, 1  ;;  %s35_s11 = sadd.s32 1, %s1537_s21 }
  0x1d   : > { %1286 = dma.vmem_to_smem (!%p1284_p10), %s170_s29, 16, %s1544_s10, [#allocation8]  }
  0x1e   : > { %p37_p12 = scmp.ge.s32.totalorder %s35_s11, 2  ;;  %s107_s12 = sadd.s32 1, %s1529_s19 }
  0x1f   : > { %s182_s7 = sshll.u32 %s2591_s2, 4  ;;  %p114_p13 = scmp.ne.s32.totalorder %s1529_s19, %s1525_s18  ;;  %s183_s7 = int_to_ptr.hbm [resolvable:$true] %s182_s7 }
  0x20   : > { %1289 = dma.hbm_to_vmem [thread:$0]  (!%p1284_p10), %s183_s7, 256, %s185_s9, [#allocation6]  }
  0x21   : > { %p115_p0 = scmp.eq.s32.totalorder %s1541_s22, 0  ;;  %s2748_s11 = smov (%p37_p12, %s35_s11), 0 }
  0x22   : > { %2592 = sst [smem:[#allocation24_spill]] %s2748_s11  ;;  %p1659_p2 = por %p144_p11, %p114_p13 }
  0x23   : > { %p1300_p4 = scmp.lt.s32.totalorder %s1541_s22, 2  ;;  %s102_s14 = ssub.s32 %s1537_s21, %s2748_s11 }
  0x24   : > { %s2593_s13 = scalar_select %p1659_p2, 1, 0 }
  0x25   : > { %s195_s15 = sand.u32 1, %s1529_s19   ;;  %p105_p6 = scmp.eq.s32.totalorder %s102_s14, 0 }
  0x26   : > { %2594 = sst [smem:[#allocation25_spill]] %s2593_s13  ;;  %p116_p9 = por %p115_p0, %p114_p13 }
  0x27   : > { %s1159_s16 = sshll.u32 %s195_s15, 3  ;;  %s1270_s1 = sshll.u32 %s1537_s21, 3 }
  0x28   : > { %s1669_s23 = scalar_select %p105_p6, %s1529_s19, %s107_s12  }
  0x29   : > { %s2596_s3 = sld [smem:[#allocation71_spill]]  ;;  %s199_s6 = scalar_lea.vmem [#allocation10], %s1159_s16 }
  0x2a   : > { %2595 = sst [smem:[#allocation26_spill]] %s1669_s23  ;;  %s210_s7 = sshll.u32 %s199_s6, 4  ;;  %s211_s7 = int_to_ptr.vmem [resolvable:$true] %s210_s7 }
  0x2b   : > { %p1291_p10 = pnand %p1300_p4, %p116_p9  ;;  %s196_s8 = scalar_lea.sflag [#allocation11], %s195_s15 }
  0x2d   : > { %219 = sbr.rel (%p1640_p7) target bundleno = 466 (0x1d2), region = 36 }
  0x2f   : > { %s206_s29 = scalar_lea.hbm %s2596_s3, %s1270_s1 }
  0x30   : > { %s208_s5 = sshll.u32 %s206_s29, 4  ;;  %s209_s5 = int_to_ptr.hbm [resolvable:$true] %s208_s5 }
  0x31   : > { %1293 = dma.hbm_to_vmem [thread:$0]  (!%p1291_p10), %s209_s5, 128, %s211_s7, %s196_s8  }
  0x32   : > { %1504 = dma.done.wait (%p1621_p1), [#allocation8], 16  }
  0x33   : > { %1506 = vsyncadd (%p1621_p1), [#allocation8], 4294967280 }
  0x34   : > { %1508 = dma.done.wait (%p1621_p1), [#allocation6], 256  }
  0x35   : > { %1510 = vsyncadd (%p1621_p1), [#allocation6], 4294967040  ;;  %s1687_s9 = sand.u32 1, %s1525_s18  }
  0x36   : > { %2597 = sst [smem:[#allocation27_spill]] %s1687_s9  ;;  %s1165_s30 = sshll.u32 %s1687_s9, 3 }
  0x37   : > { %s232_s10 = scalar_lea.sflag [#allocation11], %s1687_s9  ;;  %s235_s12 = scalar_lea.vmem [#allocation10], %s1165_s30 }
  0x38   : > { %1512 = dma.done.wait (%p1627_p3), %s232_s10, 128  }
  0x39   : > { %1514 = vsyncadd (%p1627_p3), %s232_s10, 4294967168 }
  0x3a   : > { %241 = sfence }
  0x3b   : > { %v266_v0 = vlaneseq  ;;  %v274_v1 = vld [vmem:[%s235_s12] sm:$0xff]  ;;  %v2598_v2 = vmov 0  ;;  %v1545_v3 = vmov 0.0   ;;  %vm281_vm1 = vcmask 1043456   ;;  %s1547_s24 = smov 2   ;;  %s1548_s25 = smov 1  }
  0x3c   : > { %276 = vst [vmem:[#allocation1] ss:$2 sm:$0xff] %v274_v1  ;;  %v1546_v10 = vmov -inf   ;;  %vm299_vm2 = vcmask 1040384   ;;  %s1549_s14 = smov 3   ;;  %s1550_s15 = smov 127  }
  0x3d   : > { %vm1695_vm0 = vcmp.lt.s32.totalorder %v266_v0, 256  ;;  %s1551_s16 = smov 126   ;;  %s1552_s1 = smov 125   ;;  %vm404_vm3 = vcmask 7168   ;;  %vm489_vm4 = vcmask 1022976   ;;  %vm377_vm5 = vcmask 15360  }
  0x3e   : > { %v2599_v2 = vsel %vm1695_vm0, 4294967295, %v2598_v2  ;;  %270 = vst.msk [vmem:[#allocation2] sm:$0x3] %vm1695_vm0, %v1545_v3  ;;  %s1721_s27 = sld [smem:[#allocation5 + $0x9]]  ;;  %vm347_vm6 = vcmask 23552   ;;  %vm462_vm7 = vcmask 1031168  }
  0x3f   : > { %2600 = vst [vmem:[#allocation28_spill] sm:$0xff] %v2599_v2  ;;  %s1723_s28 = sld [smem:[#allocation5 + $0x2]]  ;;  %v426_v57 = vld [vmem:[#allocation9 + $0x3] ss:$8 sm:$0x3]  ;;  %vm435_vm8 = vcmask 1039360  }
  0x40   : > { %271 = vst.msk [vmem:[#allocation3] sm:$0x3] %vm1695_vm0, %v1546_v10  ;;  %s1725_s29 = sld [smem:[#allocation5 + $0x10]]  ;;  %v1808_v59 = vld [vmem:[#allocation9 + $0x2] ss:$8 sm:$0x3] }
  0x41   : > { %s1727_s5 = sld [smem:[#allocation5 + $0x25]]  ;;  %vm574_vm9 = vcmask 392192   ;;  %vm643_vm10 = vcmask 261120   ;;  %vm712_vm11 = vcmask 130048   ;;  %vm843_vm12 = vcmask 916480  }
  0x42   : > { %s1729_s6 = sld [smem:[#allocation5 + $0x7]]  ;;  %vm912_vm13 = vcmask 785408   ;;  %vm981_vm14 = vcmask 654336  }
  0x43   : > { %v277_v4 = vld.sshfl [vmem:[#allocation1] sm:$0xff pattern:$0x75316420]  ;;  %v278_v5 = vld.sshfl [vmem:[#allocation1 + $0x8] sm:$0xff pattern:$0x75316420] }
  0x44   : > { %v282_v6 = vsel %vm281_vm1, %v277_v4, 0.0  ;;  %v289_v7 = vsel %vm281_vm1, %v278_v5, 0.0  ;;  %303 = vst [vmem:[#allocation1] ss:$2 sm:$0xff] %v274_v1  ;;  %s1731_s7 = sld [smem:[#allocation5]]  ;;  %v597_v3 = vstv %s1721_s27 }
  0x45   : > { %v283_v8 = vrot.slane %v282_v6, 4  ;;  %v290_v9 = vrot.slane %v289_v7, 4  ;;  %v272_v29 = vld [vmem:[#allocation2] sm:$0x3]  ;;  %s1733_s8 = sld [smem:[#allocation5 + $0xe]]  ;;  %v528_v4 = vstv %s1723_s28 }
  0x46   : > { %s1735_s30 = sld [smem:[#allocation5 + $0x23]]  ;;  %v666_v5 = vstv %s1725_s29 }
  0x47   : > { %v284_v11 = vadd.f32 %v283_v8, %v282_v6  ;;  %v291_v12 = vadd.f32 %v290_v9, %v289_v7  ;;  %v273_v41 = vld [vmem:[#allocation3] sm:$0x3]  ;;  %s1737_s10 = sld [smem:[#allocation5 + $0x8]]  ;;  %v866_v9 = vstv %s1727_s5 }
  0x48   : > { %s1739_s12 = sld [smem:[#allocation5 + $0x1]]  ;;  %v582_v7 = vstv %s1729_s6 }
  0x49   : > { %v285_v13 = vrot.slane %v284_v11, 2  ;;  %v292_v14 = vrot.slane %v291_v12, 2  ;;  %s1753_s0 = sld [smem:[#allocation5 + $0xb]] }
  0x4a   : > { %s1755_s2 = sld [smem:[#allocation5 + $0x4]]  ;;  %v513_v8 = vstv %s1731_s7 }
  0x4b   : > { %v286_v15 = vadd.f32 %v285_v13, %v284_v11  ;;  %v293_v16 = vadd.f32 %v292_v14, %v291_v12  ;;  %v304_v17 = vld.sshfl [vmem:[#allocation1] sm:$0xff pattern:$0x75316420]  ;;  %v305_v18 = vld.sshfl [vmem:[#allocation1 + $0x8] sm:$0xff pattern:$0x75316420]  ;;  %v651_v11 = vstv %s1733_s8 }
  0x4c   : > { %v308_v19 = vsel %vm281_vm1, %v304_v17, -inf  ;;  %v315_v20 = vsel %vm281_vm1, %v305_v18, -inf  ;;  %s1757_s3 = sld [smem:[#allocation5 + $0x14]]  ;;  %v851_v12 = vstv %s1735_s30 }
  0x4d   : > { %v287_v21 = vrot.slane %v286_v15, 1  ;;  %v294_v22 = vrot.slane %v293_v16, 1  ;;  %v309_v23 = vrot.slane %v308_v19, 4  ;;  %v316_v24 = vrot.slane %v315_v20, 4  ;;  %s1759_s11 = sld [smem:[#allocation5 + $0x2a]] }
  0x4e   : > { %s1761_s21 = sld [smem:[#allocation5 + $0x12]]  ;;  %v589_v10 = vstv %s1737_s10 }
  0x4f   : > { %v288_v25 = vadd.f32 %v287_v21, %v286_v15  ;;  %v295_v26 = vadd.f32 %v294_v22, %v293_v16  ;;  %v310_v27 = vmax.f32 %v308_v19, %v309_v23  ;;  %v317_v28 = vmax.f32 %v315_v20, %v316_v24  ;;  %2604 = sst [smem:[#allocation32_spill]] %s1753_s0 }
  0x50   : > { %2605 = sst [smem:[#allocation33_spill]] %s1755_s2  ;;  %v520_v15 = vstv %s1739_s12 }
  0x51   : > { %v298_v30 = vrot.slane %v295_v26, 7  ;;  %v311_v31 = vrot.slane %v310_v27, 2  ;;  %v318_v32 = vrot.slane %v317_v28, 2  ;;  %s1763_s23 = sld [smem:[#allocation5 + $0x29]] }
  0x52   : > { %s1765_s19 = sld [smem:[#allocation5 + $0x2c]] }
  0x53   : > { %v300_v33 = vsel %vm299_vm2, %v288_v25, %v298_v30  ;;  %v312_v34 = vmax.f32 %v310_v27, %v311_v31  ;;  %v319_v35 = vmax.f32 %v317_v28, %v318_v32  ;;  %2606 = sst [smem:[#allocation34_spill]] %s1759_s11 }
  0x54   : > { %v302_v36 = vadd.f32 %v300_v33, %v272_v29  ;;  %2607 = sst [smem:[#allocation35_spill]] %s1761_s21 }
  0x55   : > { %v313_v37 = vrot.slane %v312_v34, 1  ;;  %v320_v38 = vrot.slane %v319_v35, 1  ;;  %s1767_s18 = sld [smem:[#allocation5 + $0x38]] }
  0x56   : > { %332 = vst.msk [vmem:[#allocation2] sm:$0x3] %vm1695_vm0, %v302_v36  ;;  %s1769_s22 = sld [smem:[#allocation5 + $0x39]] }
  0x57   : > { %v314_v39 = vmax.f32 %v312_v34, %v313_v37  ;;  %v321_v40 = vmax.f32 %v319_v35, %v320_v38  ;;  %2608 = sst [smem:[#allocation36_spill]] %s1763_s23  ;;  %v698_v35 = vstv %s1757_s3 }
  0x58   : > { %s1771_s26 = sld [smem:[#allocation5 + $0xa]]  ;;  %v935_v25 = vstv %s1765_s19 }
  0x59   : > { %v324_v42 = vrot.slane %v321_v40, 7  ;;  %s1773_s17 = sld [smem:[#allocation5 + $0x31]] }
  0x5a   : > { %s1775_s13 = sld [smem:[#allocation5 + $0x3b]] }
  0x5b   : > { %v325_v43 = vsel %vm299_vm2, %v314_v39, %v324_v42  ;;  %2609 = sst [smem:[#allocation37_spill]] %s1767_s18 }
  0x5c   : > { %v327_v44 = vmax.f32 %v273_v41, %v325_v43  ;;  %2610 = sst [smem:[#allocation38_spill]] %s1769_s22 }
  0x5d   : > { %v1711_v45 = vld [vmem:[#allocation2] sm:$0x3]  ;;  %s1777_s4 = sld [smem:[#allocation5 + $0x32]] }
  0x5e   : > { %v342_v46 = vperm.slane %v1711_v45, 1  ;;  %v341_v47 = vperm.slane %v1711_v45, 0  ;;  %333 = vst.msk [vmem:[#allocation3] sm:$0x3] %vm1695_vm0, %v327_v44  ;;  %2611 = sst [smem:[#allocation39_spill]] %s1771_s26  ;;  %v1821_v62 = vmul.f32 %v426_v57, %v1711_v45 }
  0x5f   : > { %2612 = sst [smem:[#allocation40_spill]] %s1773_s17  ;;  %v1911_v45 = vld [vmem:[#allocation9] ss:$8 sm:$0x3] }
  0x60   : > { %375 = vrot.lane.b32.xlu1 %v342_v46, %s1547_s24  ;;  %400 = vrot.lane.b32.xlu2 %v341_v47, %s1548_s25  ;;  %s1779_s20 = sld [smem:[#allocation5 + $0x3c]]  ;;  %2626 = vst [vmem:[#allocation54_spill] sm:$0xff] %v1821_v62 }
  0x61   : > { %343 = vrot.lane.b32.xlu0 %v341_v47, %s1549_s14  ;;  %s1781_s9 = sld [smem:[#allocation5 + $0x3]] }
  0x62   : > { %s1783_s23 = sld [smem:[#allocation5 + $0x3a]] }
  0x63   : > { %2613 = sst [smem:[#allocation41_spill]] %s1777_s4 }
  0x64   : > { %s1785_s11 = sld [smem:[#allocation5 + $0x33]] }
  0x65   : > { %v1717_v48 = vld [vmem:[#allocation3] sm:$0x3]  ;;  %s1787_s18 = sld [smem:[#allocation5 + $0x34]] }
  0x66   : > { %v357_v49 = vperm.slane %v1717_v48, 0  ;;  %v358_v50 = vperm.slane %v1717_v48, 1  ;;  %2614 = sst [smem:[#allocation42_spill]] %s1779_s20  ;;  %v1824_v63 = vmul.f32 %v426_v57, %v1717_v48 }
  0x67   : > { %s1790_s26 = sld [smem:[#allocation5 + $0x35]]  ;;  %v536_v44 = vstv %s1781_s9 }
  0x68   : > { %431 = vrot.lane.b32.xlu1 %v341_v47, %s1550_s15  ;;  %402 = vrot.lane.b32.xlu2 %v342_v46, %s1548_s25  ;;  %2615 = sst [smem:[#allocation43_spill]] %s1783_s23  ;;  %2627 = vst [vmem:[#allocation55_spill] sm:$0xff] %v1824_v63 }
  0x69   : > { %345 = vrot.lane.b32.xlu0 %v342_v46, %s1549_s14  ;;  %s1794_s17 = sld [smem:[#allocation5 + $0x3f]] }
  0x6a   : > { %2616 = sst [smem:[#allocation44_spill]] %s1785_s11 }
  0x6b   : > { %2617 = sst [smem:[#allocation45_spill]] %s1787_s18 }
  0x6c   : > { %s1796_s4 = sld [smem:[#allocation5 + $0x40]] }
  0x6d   : > { %2618 = sst [smem:[#allocation46_spill]] %s1790_s26 }
  0x6e   : > { %s1798_s20 = sld [smem:[#allocation5 + $0xc]] }
  0x6f   : > { %2619 = sst [smem:[#allocation47_spill]] %s1794_s17 }
  0x70   : > { %460 = vrot.lane.b32.xlu1 %v342_v46, %s1551_s16  ;;  %487 = vrot.lane.b32.xlu2 %v342_v46, %s1552_s1  ;;  %s1801_s23 = sld [smem:[#allocation5 + $0x5]] }
  0x71   : > { %373 = vrot.lane.b32.xlu0 %v341_v47, %s1547_s24  ;;  %s1803_s11 = sld [smem:[#allocation5 + $0x41]] }
  0x72   : > { %2620 = sst [smem:[#allocation48_spill]] %s1796_s4 }
  0x73   : > { %s1805_s18 = sld [smem:[#allocation5 + $0x11]] }
  0x74   : > { %2621 = sst [smem:[#allocation49_spill]] %s1798_s20 }
  0x75   : > { %s1810_s26 = sld [smem:[#allocation5 + $0x42]] }
  0x76   : > { %2622 = sst [smem:[#allocation50_spill]] %s1801_s23 }
  0x77   : > { %2623 = sst [smem:[#allocation51_spill]] %s1803_s11 }
  0x78   : > { %359 = vrot.lane.b32.xlu1 %v357_v49, %s1549_s14  ;;  %386 = vrot.lane.b32.xlu2 %v357_v49, %s1547_s24  ;;  %s1812_s4 = sld [smem:[#allocation5 + $0x43]] }
  0x79   : > { %433 = vrot.lane.b32.xlu0 %v342_v46, %s1550_s15  ;;  %s1818_s23 = sld [smem:[#allocation5 + $0x13]]  ;;  %v608_v46 = vstv %s1775_s13  ;;  %v674_v57 = vstv %s1805_s18 }
  0x7a   : > { %s1829_s20 = sld [smem:[#allocation5 + $0x54]] }
  0x7b   : > { %s1842_s11 = sld [smem:[#allocation5 + $0x36]] }
  0x7c   : > { %s1859_s27 = sld [smem:[#allocation5 + $0x27]] }
  0x7d   : > { %s1869_s28 = sld [smem:[#allocation5 + $0x1d]] }
  0x7e   : > { %2624 = sst [smem:[#allocation52_spill]] %s1812_s4 }
  0x7f   : > { %2625 = sst [smem:[#allocation53_spill]] %s1818_s23 }
  0x80   : > { %361 = vrot.lane.b32.xlu1 %v358_v50, %s1549_s14  ;;  %415 = vrot.lane.b32.xlu2 %v358_v50, %s1548_s25  ;;  %s1745_s14 = sld [smem:[#allocation5 + $0x24]] }
  0x81   : > { %388 = vrot.lane.b32.xlu0 %v358_v50, %s1547_s24  ;;  %s1741_s24 = sld [smem:[#allocation5 + $0xf]] }
  0x82   : > { %s1832_s23 = sld [smem:[#allocation5 + $0x3d]] }
  0x83   : > { %2629 = sst [smem:[#allocation57_spill]] %s1842_s11 }
  0x84   : > { %s1846_s4 = sld [smem:[#allocation5 + $0x3e]] }
  0x85   : > { %s2631_s29 = sld [smem:[#allocation34_spill]] }
  0x86   : > { %2601 = sst [smem:[#allocation29_spill]] %s1745_s14  ;;  %v858_v23 = vstv %s1745_s14 }
  0x87   : > { %v658_v17 = vstv %s1741_s24  ;;  %s1873_s5 = sld [smem:[#allocation5 + $0x55]] }
  0x88   : > { %413 = vrot.lane.b32.xlu1 %v357_v49, %s1548_s25  ;;  %446 = vrot.lane.b32.xlu2 %v358_v50, %s1550_s15  ;;  %s1743_s25 = sld [smem:[#allocation5 + $0x1c]] }
  0x89   : > { %444 = vrot.lane.b32.xlu0 %v357_v49, %s1550_s15  ;;  %s1747_s15 = sld [smem:[#allocation5 + $0x1e]] }
  0x8a   : > { %2628 = sst [smem:[#allocation56_spill]] %s1832_s23 }
  0x8b   : > { %2630 = sst [smem:[#allocation58_spill]] %s1846_s4  ;;  %v920_v36 = vstv %s2631_s29 }
  0x8c   : > { %s2633_s4 = sld [smem:[#allocation36_spill]] }
  0x8d   : > { %s2634_s11 = sld [smem:[#allocation39_spill]] }
  0x8e   : > { %v782_v21 = vstv %s1743_s25  ;;  %s2635_s19 = sld [smem:[#allocation40_spill]] }
  0x8f   : > { %v797_v13 = vstv %s1747_s15  ;;  %s1896_s14 = sld [smem:[#allocation5 + $0x15]] }
  0x90   : > { %473 = vrot.lane.b32.xlu1 %v358_v50, %s1551_s16  ;;  %485 = vrot.lane.b32.xlu2 %v341_v47, %s1552_s1  ;;  %s2637_s2 = sld [smem:[#allocation45_spill]] }
  0x91   : > { %458 = vrot.lane.b32.xlu0 %v341_v47, %s1551_s16  ;;  %s1900_s0 = sld [smem:[#allocation5 + $0x26]] }
  0x92   : > { %v898_v39 = vstv %s2633_s4  ;;  %s1909_s21 = sld [smem:[#allocation5 + $0x57]] }
  0x93   : > { %v605_v43 = vstv %s2634_s11  ;;  %s1917_s15 = sld [smem:[#allocation5 + $0x58]] }
  0x94   : > { %s1923_s9 = sld [smem:[#allocation5 + $0x4d]] }
  0x95   : > { %s2644_s13 = sld [smem:[#allocation43_spill]] }
  0x96   : > { %s1933_s17 = sld [smem:[#allocation5 + $0x20]] }
  0x97   : > { %s1953_s18 = sld [smem:[#allocation5 + $0x1f]] }
  0x98   : > { %471 = vrot.lane.b32.xlu1 %v357_v49, %s1551_s16  ;;  %498 = vrot.lane.b32.xlu2 %v357_v49, %s1552_s1  ;;  %s1749_s16 = sld [smem:[#allocation5 + $0xd]] }
  0x99   : > { %500 = vrot.lane.b32.xlu0 %v358_v50, %s1552_s1  ;;  %s1751_s1 = sld [smem:[#allocation5 + $0x6]] }
  0x9a   : > { %2640 = sst [smem:[#allocation34_spill]] %s1917_s15 }
  0x9b   : > { %2643 = sst [smem:[#allocation36_spill]] %s1923_s9 }
  0x9c   : > { %s2646_s11 = sld [smem:[#allocation52_spill]] }
  0x9d   : > { %s1973_s23 = sld [smem:[#allocation5 + $0x17]] }
  0x9e   : > { %2602 = sst [smem:[#allocation30_spill]] %s1749_s16  ;;  %v629_v22 = vstv %s1749_s16 }
  0x9f   : > { %2603 = sst [smem:[#allocation31_spill]] %s1751_s1  ;;  %v560_v31 = vstv %s1751_s1 }
  0xa0   : > { %s1890_s16 = sld [smem:[#allocation5 + $0x56]] }
  0xa1   : > { %s2638_s1 = sld [smem:[#allocation48_spill]] }
  0xa2   : > { %s2007_s22 = sld [smem:[#allocation5 + $0x4e]] }
  0xa3   : > { %s2026_s8 = sld [smem:[#allocation5 + $0x30]] }
  0xa4   : > { %s2034_s30 = sld [smem:[#allocation5 + $0x28]] }
  0xa5   : > { %s2038_s25 = sld [smem:[#allocation5 + $0x44]] }
  0xa6   : > { %s2056_s15 = sld [smem:[#allocation5 + $0x50]] }
  0xa7   : > { %s2069_s10 = sld [smem:[#allocation5 + $0x4f]] }
  0xa8   : > { %2650 = sst [smem:[#allocation39_spill]] %s2007_s22 }
  0xa9   : > { %s2656_s29 = sld [smem:[#allocation56_spill]] }
  0xaa   : > { %s2085_s12 = sld [smem:[#allocation5 + $0x2e]] }
  0xab   : > { %s2089_s6 = sld [smem:[#allocation5 + $0x45]] }
  0xac   : > { %s2661_s24 = sld [smem:[#allocation58_spill]]  ;;  %v808_v2 = vstv %s2056_s15 }
  0xad   : > { %s2103_s9 = sld [smem:[#allocation5 + $0x51]] }
  0xae   : > { %s2665_s22 = sld [smem:[#allocation33_spill]] }
  0xaf   : > { %s2666_s7 = sld [smem:[#allocation35_spill]] }
  0xb0   : > { %s2671_s3 = sld [smem:[#allocation37_spill]] }
  0xb1   : > { %s2162_s4 = sld [smem:[#allocation5 + $0x16]] }
  0xb2   : > { %s2672_s15 = sld [smem:[#allocation47_spill]] }
  0xba   : > { %v401_v51 = vpop.permute.xlu2 %400 }
  0xbb   : > { %v407_v56 = vsel %vm404_vm3, 0.0, %v401_v51 }
  0xc2   : > { %v403_v52 = vpop.permute.xlu2 %402 }
  0xc3   : > { %v405_v53 = vsel %vm404_vm3, %v401_v51, %v403_v52  ;;  %v539_v51 = vstv %s2637_s2  ;;  %s1941_s2 = sld [smem:[#allocation5 + $0x22]] }
  0xc4   : > { %v409_v55 = vrot.slane %v405_v53, 7 }
  0xc6   : > { %v410_v58 = vsel %vm299_vm2, %v407_v56, %v409_v55  ;;  %v1926_v55 = vmul.f32 %v605_v43, %v1821_v62  ;;  %v1929_v56 = vmul.f32 %v536_v44, %v1821_v62  ;;  %v874_v44 = vstv %s1900_s0  ;;  %v1979_v43 = vld [vmem:[#allocation9 + $0x1] ss:$8 sm:$0x3]  ;;  %s1990_s0 = sld [smem:[#allocation5 + $0x37]] }
  0xc7   : > { %v1827_v1 = vmul.f32 %v410_v58, %v1808_v59  ;;  %v789_v58 = vstv %s1869_s28  ;;  %s2663_s28 = sld [smem:[#allocation32_spill]] }
  0xc9   : > { %v1852_v14 = vmul.f32 %v597_v3, %v1827_v1  ;;  %v1856_v16 = vmul.f32 %v528_v4, %v1827_v1  ;;  %v1863_v19 = vmul.f32 %v666_v5, %v1827_v1  ;;  %v1866_v20 = vmul.f32 %v866_v9, %v1827_v1 }
  0xca   : > { %v1792_v54 = vpop.permute.xlu2 %487  ;;  %v1876_v24 = vmul.f32 %v797_v13, %v1827_v1  ;;  %v1904_v40 = vmul.f32 %v935_v25, %v1827_v1  ;;  %v1937_v3 = vmul.f32 %v608_v46, %v1824_v63  ;;  %v677_v4 = vstv %s1810_s26  ;;  %s1960_s26 = sld [smem:[#allocation5 + $0x2b]] }
  0xcb   : > { %v1838_v6 = vsel %vm489_vm4, %v1792_v54, 0.0  ;;  %v1958_v46 = vmul.f32 %v674_v57, %v1821_v62  ;;  %v1970_v25 = vmul.f32 %v677_v4, %v1824_v63 }
  0xcc   : > { %v494_v18 = vrot.slane %v1838_v6, 7  ;;  %2639 = vst [vmem:[#allocation59_spill] sm:$0xff] %v1904_v40 }
  0xd2   : > { %v1814_v60 = vpop.permute.xlu1 %375  ;;  %v1816_v61 = vpop.permute.xlu2 %386 }
  0xd3   : > { %v344_v0 = vpop.permute.xlu0 %343  ;;  %v1881_v26 = vsel %vm377_vm5, 0.0, %v1816_v61 }
  0xd4   : > { %v350_v32 = vsel %vm347_vm6, 0.0, %v344_v0 }
  0xda   : > { %v1883_v27 = vpop.permute.xlu1 %431  ;;  %v1885_v28 = vpop.permute.xlu2 %415 }
  0xdb   : > { %v346_v33 = vpop.permute.xlu0 %345 }
  0xdc   : > { %v348_v37 = vsel %vm347_vm6, %v344_v0, %v346_v33 }
  0xdd   : > { %v352_v41 = vrot.slane %v348_v37, 7 }
  0xdf   : > { %v353_v50 = vsel %vm299_vm2, %v350_v32, %v352_v41  ;;  %v1949_v32 = vmul.f32 %v539_v51, %v1824_v63 }
  0xe0   : > { %v355_v0 = vmul.f32 %v353_v50, %v1911_v45  ;;  %v720_v50 = vstv %s1896_s14  ;;  %s2647_s14 = sld [smem:[#allocation51_spill]] }
  0xe2   : > { %v1943_v9 = vpop.permute.xlu1 %460  ;;  %v1945_v13 = vpop.permute.xlu2 %446  ;;  %v1983_v5 = vmul.f32 %v582_v7, %v355_v0  ;;  %v1994_v52 = vmul.f32 %v651_v11, %v355_v0  ;;  %v1998_v48 = vmul.f32 %v851_v12, %v355_v0  ;;  %v2016_v7 = vmul.f32 %v782_v21, %v355_v0 }
  0xe3   : > { %v374_v41 = vpop.permute.xlu0 %373  ;;  %v1965_v51 = vsel %vm462_vm7, %v1943_v9, 0.0  ;;  %v1977_v57 = vsel %vm435_vm8, %v1945_v13, 0.0  ;;  %v2045_v21 = vmul.f32 %v720_v50, %v355_v0 }
  0xe4   : > { %v378_v33 = vsel %vm377_vm5, %v374_v41, %v1814_v60  ;;  %v1987_v60 = vmul.f32 %v513_v8, %v355_v0  ;;  %v380_v4 = vsel %vm377_vm5, 0.0, %v374_v41  ;;  %v2005_v41 = vmul.f32 %v874_v44, %v1821_v62 }
  0xe5   : > { %v382_v37 = vrot.slane %v378_v33, 7  ;;  %v877_v33 = vstv %s1909_s21  ;;  %s2018_s21 = sld [smem:[#allocation5 + $0x5b]]  ;;  %v2042_v8 = vmul.f32 %v920_v36, %v355_v0  ;;  %2654 = vst [vmem:[#allocation62_spill] sm:$0xff] %v2045_v21  ;;  %v735_v36 = vstv %s1973_s23  ;;  %v2062_v0 = vld [vmem:[#allocation9 + $0x4] ss:$8 sm:$0x3] }
  0xe6   : > { %s2708_s23 = sld [smem:[#allocation39_spill]] }
  0xe7   : > { %v383_v42 = vsel %vm299_vm2, %v380_v4, %v382_v37  ;;  %v2021_v37 = vmul.f32 %v877_v33, %v1824_v63  ;;  %2652 = vst [vmem:[#allocation61_spill] sm:$0xff] %v2042_v8  ;;  %v927_v4 = vstv %s1960_s26  ;;  %s2330_s26 = sld [smem:[#allocation5 + $0x53]] }
  0xe8   : > { %v2011_v12 = vmul.f32 %v383_v42, %v1979_v43  ;;  %v2028_v42 = vld [vmem:[#allocation9 + $0x6] ss:$8 sm:$0x3] }
  0xea   : > { %2651 = vst [vmem:[#allocation60_spill] sm:$0xff] %v2011_v12  ;;  %v360_v11 = vpop.permute.xlu1 %359  ;;  %v486_v49 = vpop.permute.xlu2 %485 }
  0xeb   : > { %v490_v33 = vsel %vm489_vm4, %v486_v49, %v1792_v54  ;;  %v434_v44 = vpop.permute.xlu0 %433  ;;  %v2054_v54 = vmul.f32 %v589_v10, %v2011_v12  ;;  %v805_v10 = vstv %s1953_s18  ;;  %v365_v50 = vsel %vm347_vm6, 0.0, %v360_v11  ;;  %s2658_s18 = sld [smem:[#allocation57_spill]] }
  0xec   : > { %v495_v47 = vsel %vm299_vm2, %v490_v33, %v494_v18  ;;  %v438_v53 = vsel %vm435_vm8, %v434_v44, 0.0  ;;  %v2067_v18 = vmul.f32 %v520_v15, %v2011_v12  ;;  %v436_v33 = vsel %vm435_vm8, %v1883_v27, %v434_v44 }
  0xed   : > { %v2060_v49 = vmul.f32 %v495_v47, %v2028_v42  ;;  %v440_v6 = vrot.slane %v438_v53, 7  ;;  %v2078_v47 = vmul.f32 %v658_v17, %v2011_v12  ;;  %v2083_v15 = vmul.f32 %v858_v23, %v2011_v12 }
  0xee   : > { %v2094_v27 = vmul.f32 %v789_v58, %v2011_v12  ;;  %v2101_v23 = vmul.f32 %v805_v10, %v1821_v62  ;;  %v2117_v17 = vmul.f32 %v735_v36, %v1827_v1  ;;  %v951_v1 = vstv %s2085_s12  ;;  %s2312_s12 = sld [smem:[#allocation5 + $0x52]] }
  0xef   : > { %v441_v53 = vsel %vm299_vm2, %v436_v33, %v440_v6  ;;  %v2107_v33 = vmul.f32 %v927_v4, %v2011_v12  ;;  %v2113_v58 = vmul.f32 %v629_v22, %v2060_v49  ;;  %v2123_v4 = vmul.f32 %v560_v31, %v2060_v49 }
  0xf0   : > { %v2098_v44 = vmul.f32 %v441_v53, %v2062_v0  ;;  %v967_v53 = vstv %s2026_s8  ;;  %2664 = vst [vmem:[#allocation65_spill] sm:$0xff] %v2117_v17  ;;  %v2128_v6 = vmul.f32 %v698_v35, %v2060_v49  ;;  %v2137_v34 = vmul.f32 %v898_v39, %v2060_v49  ;;  %s2673_s8 = sld [smem:[#allocation38_spill]] }
  0xf1   : > { %2662 = vst [vmem:[#allocation64_spill] sm:$0xff] %v2107_v33  ;;  %v2667_v35 = vstv %s2663_s28  ;;  %v2669_v39 = vstv %s2666_s7  ;;  %s2674_s7 = sld [smem:[#allocation41_spill]]  ;;  %v2176_v17 = vmul.f32 %v808_v2, %v1824_v63  ;;  %v2677_v12 = vstv %s1941_s2 }
  0xf2   : > { %2660 = vst [vmem:[#allocation63_spill] sm:$0xff] %v2098_v44  ;;  %v362_v10 = vpop.permute.xlu1 %361  ;;  %v2144_v22 = vmul.f32 %v2667_v35, %v2098_v44  ;;  %v2685_v62 = vstv %s2638_s1  ;;  %v2686_v33 = vstv %s1829_s20  ;;  %s2689_s20 = sld [smem:[#allocation44_spill]] }
  0xf3   : > { %v363_v38 = vsel %vm347_vm6, %v360_v11, %v362_v10  ;;  %v389_v30 = vpop.permute.xlu0 %388  ;;  %v2668_v10 = vstv %s2665_s22  ;;  %s2166_s22 = sld [smem:[#allocation5 + $0x59]]  ;;  %2675 = vst [vmem:[#allocation66_spill] sm:$0xff] %v2176_v17 }
  0xf4   : > { %v367_v29 = vrot.slane %v363_v38, 7  ;;  %v390_v31 = vsel %vm377_vm5, %v1816_v61, %v389_v30  ;;  %v2150_v36 = vmul.f32 %v2668_v10, %v2098_v44  ;;  %v2155_v38 = vmul.f32 %v2669_v39, %v2098_v44  ;;  %s2691_s1 = sld [smem:[#allocation46_spill]] }
  0xf5   : > { %v394_v11 = vrot.slane %v390_v31, 7  ;;  %v2670_v61 = vstv %s1859_s27  ;;  %s2242_s27 = sld [smem:[#allocation5 + $0x5c]] }
  0xf6   : > { %v2160_v30 = vmul.f32 %v2670_v61, %v2098_v44  ;;  %v368_v31 = vsel %vm299_vm2, %v365_v50, %v367_v29  ;;  %v2676_v29 = vstv %s1933_s17  ;;  %s2688_s17 = sld [smem:[#allocation42_spill]] }
  0xf7   : > { %v2171_v39 = vmul.f32 %v368_v31, %v1911_v45  ;;  %v395_v61 = vsel %vm299_vm2, %v1881_v26, %v394_v11  ;;  %v2181_v50 = vmul.f32 %v2676_v29, %v2098_v44  ;;  %v2191_v45 = vmul.f32 %v2677_v12, %v2060_v49  ;;  %s2703_s2 = sld [smem:[#allocation53_spill]] }
  0xf8   : > { %v2184_v35 = vmul.f32 %v395_v61, %v1979_v43  ;;  %v2679_v31 = vstv %s2671_s3  ;;  %v2680_v26 = vstv %s2635_s19  ;;  %v2681_v11 = vstv %s2672_s15  ;;  %s2699_s19 = sld [smem:[#allocation49_spill]]  ;;  %s1553_s15 = smov 32  }
  0xf9   : > { %2678 = vst [vmem:[#allocation67_spill] sm:$0xff] %v2191_v45  ;;  %v586_v40 = vmul.f32 %v2679_v31, %v2171_v39  ;;  %v517_v2 = vmul.f32 %v2680_v26, %v2171_v39  ;;  %v655_v63 = vmul.f32 %v2681_v11, %v2171_v39  ;;  %v2203_v29 = vmul.f32 %v951_v1, %v2098_v44  ;;  %s2350_s28 = sld [smem:[#allocation5 + $0x2d]] }
  0xfa   : > { %v414_v43 = vpop.permute.xlu1 %413  ;;  %v2683_v61 = vstv %s2673_s8  ;;  %v2684_v21 = vstv %s2674_s7  ;;  %v662_v31 = vmul.f32 %v2685_v62, %v2184_v35  ;;  %v855_v26 = vmul.f32 %v2686_v33, %v2171_v39  ;;  %s2414_s3 = sld [smem:[#allocation5 + $0x49]] }
  0xfb   : > { %2682 = vst [vmem:[#allocation68_spill] sm:$0xff] %v2203_v29  ;;  %v593_v10 = vmul.f32 %v2683_v61, %v2184_v35  ;;  %v524_v12 = vmul.f32 %v2684_v21, %v2184_v35  ;;  %v417_v11 = vsel %vm404_vm3, %v414_v43, %v1885_v28  ;;  %v419_v1 = vsel %vm404_vm3, 0.0, %v414_v43  ;;  %v445_v44 = vpop.permute.xlu0 %444  ;;  %s2421_s8 = sld [smem:[#allocation5 + $0x19]] }
  0xfc   : > { %v587_v61 = vadd.f32 %v586_v40, %v1983_v5  ;;  %v518_v29 = vadd.f32 %v517_v2, %v1987_v60  ;;  %v421_v8 = vrot.slane %v417_v11, 7  ;;  %v448_v21 = vsel %vm435_vm8, %v445_v44, %v1945_v13  ;;  %s2426_s7 = sld [smem:[#allocation5 + $0x4a]] }
  0xfd   : > { %v594_v62 = vadd.f32 %v593_v10, %v2054_v54  ;;  %v525_v33 = vadd.f32 %v524_v12, %v2067_v18  ;;  %v2687_v45 = vrot.slane %v1977_v57, 7  ;;  %v656_v17 = vadd.f32 %v655_v63, %v1994_v52 }
  0xfe   : > { %v2231_v43 = vmul.f32 %v967_v53, %v2060_v49  ;;  %v727_v40 = vstv %s2162_s4  ;;  %v422_v5 = vsel %vm299_vm2, %v419_v1, %v421_v8  ;;  %v2690_v60 = vstv %s1873_s5  ;;  %s2266_s5 = sld [smem:[#allocation5 + $0x5a]] }
  0xff   : > { %v453_v28 = vsel %vm299_vm2, %v448_v21, %v2687_v45  ;;  %v862_v57 = vmul.f32 %v2690_v60, %v2184_v35  ;;  %v893_v54 = vstv %s2166_s22  ;;  %v2245_v63 = vmul.f32 %v422_v5, %v1808_v59  ;;  %s1554_s22 = smov 48   ;;  %s2453_s4 = sld [smem:[#allocation5 + $0x4c]] }
 0x100   : > { %v2236_v13 = vmul.f32 %v453_v28, %v2062_v0  ;;  %v599_v52 = vadd.f32 %v1852_v14, %v587_v61  ;;  %v663_v18 = vadd.f32 %v662_v31, %v2078_v47  ;;  %v856_v8 = vadd.f32 %v855_v26, %v1998_v48  ;;  %v457_v26 = vld [vmem:[#allocation9 + $0x5] ss:$8 sm:$0x3] }
 0x101   : > { %v607_v0 = vadd.f32 %v1926_v55, %v594_v62  ;;  %v530_v44 = vadd.f32 %v1856_v16, %v518_v29  ;;  %v538_v53 = vadd.f32 %v1929_v56, %v525_v33  ;;  %v668_v10 = vadd.f32 %v1863_v19, %v656_v17 }
 0x102   : > { %v2692_v45 = vstv %s2644_s13  ;;  %v2693_v59 = vstv %s2688_s17  ;;  %v2694_v14 = vstv %s2689_s20  ;;  %v2695_v47 = vstv %s2647_s14  ;;  %v474_v16 = vpop.permute.xlu1 %473  ;;  %s2702_s13 = sld [smem:[#allocation50_spill]] }
 0x103   : > { %v601_v2 = vmul.f32 %v2692_v45, %v2245_v63  ;;  %v617_v12 = vmul.f32 %v2693_v59, %v2236_v13  ;;  %v532_v11 = vmul.f32 %v2694_v14, %v2245_v63  ;;  %v670_v48 = vmul.f32 %v2695_v47, %v2245_v63  ;;  %v459_v1 = vpop.permute.xlu0 %458  ;;  %s2302_s14 = sld [smem:[#allocation5 + $0x21]] }
 0x104   : > { %v2696_v55 = vstv %s2691_s1  ;;  %v863_v19 = vadd.f32 %v862_v57, %v2083_v15  ;;  %v868_v17 = vadd.f32 %v1866_v20, %v856_v8  ;;  %v2697_v29 = vstv %s1890_s16  ;;  %s2701_s16 = sld [smem:[#allocation34_spill]] }
 0x105   : > { %v548_v56 = vmul.f32 %v2696_v55, %v2236_v13  ;;  %v870_v31 = vmul.f32 %v2697_v29, %v2245_v63  ;;  %v602_v61 = vadd.f32 %v601_v2, %v599_v52  ;;  %v533_v21 = vadd.f32 %v532_v11, %v530_v44  ;;  %s2432_s17 = sld [smem:[#allocation5 + $0x1a]] }
 0x106   : > { %v671_v62 = vadd.f32 %v670_v48, %v668_v10  ;;  %v676_v33 = vadd.f32 %v1958_v46, %v663_v18  ;;  %v477_v28 = vsel %vm462_vm7, %v474_v16, 0.0  ;;  %v463_v5 = vsel %vm462_vm7, %v459_v1, %v1943_v9  ;;  %s2438_s20 = sld [smem:[#allocation5 + $0x4b]] }
 0x107   : > { %v2698_v15 = vstv %s2646_s11  ;;  %v871_v60 = vadd.f32 %v870_v31, %v868_v17  ;;  %v2700_v57 = vrot.slane %v1965_v51, 7  ;;  %v615_v52 = vadd.f32 %v2144_v22, %v602_v61  ;;  %s2706_s11 = sld [smem:[#allocation36_spill]]  ;;  %v499_v31 = vpop.permute.xlu2 %498 }
 0x108   : > { %v686_v20 = vmul.f32 %v2698_v15, %v2236_v13  ;;  %v546_v46 = vadd.f32 %v2150_v36, %v533_v21  ;;  %v684_v18 = vadd.f32 %v2155_v38, %v671_v62  ;;  %v876_v9 = vadd.f32 %v2005_v41, %v863_v19  ;;  %s2444_s1 = sld [smem:[#allocation5 + $0x1b]] }
 0x109   : > { %v468_v8 = vsel %vm299_vm2, %v463_v5, %v2700_v57  ;;  %v884_v10 = vadd.f32 %v2160_v30, %v871_v60  ;;  %v930_v45 = vstv %s2242_s27  ;;  %v610_v51 = vadd.f32 %v1937_v3, %v607_v0  ;;  %s1555_s27 = smov 16  }
 0x10a   : > { %v2289_v44 = vmul.f32 %v468_v8, %v457_v26  ;;  %v618_v2 = vadd.f32 %v617_v12, %v615_v52  ;;  %v549_v59 = vadd.f32 %v548_v56, %v546_v46  ;;  %v687_v14 = vadd.f32 %v686_v20, %v684_v18 }
 0x10b   : > { %v479_v22 = vrot.slane %v477_v28, 7  ;;  %v2704_v11 = vstv %s2699_s19  ;;  %v541_v38 = vadd.f32 %v1949_v32, %v538_v53  ;;  %v2705_v47 = vstv %s2701_s16  ;;  %v472_v32 = vpop.permute.xlu1 %471  ;;  %v501_v1 = vpop.permute.xlu0 %500  ;;  %s1557_s19 = smov 112   ;;  %s1558_s16 = smov 80  }
 0x10c   : > { %v622_v36 = vmul.f32 %v2704_v11, %v2289_v44  ;;  %v886_v48 = vmul.f32 %v2705_v47, %v2236_v13  ;;  %v2707_v41 = vstv %s2702_s13  ;;  %v679_v3 = vadd.f32 %v1970_v25, %v676_v33  ;;  %s510_s13 = sld [smem:[#allocation4]] }
 0x10d   : > { %v553_v30 = vmul.f32 %v2707_v41, %v2289_v44  ;;  %v2709_v0 = vstv %s2703_s2  ;;  %v901_v55 = vstv %s2266_s5  ;;  %v631_v53 = vadd.f32 %v2113_v58, %v618_v2  ;;  %s1556_s5 = smov 96   ;;  %s2734_s2 = sld [smem:[#allocation27_spill]] }
 0x10e   : > { %v691_v12 = vmul.f32 %v2709_v0, %v2289_v44  ;;  %v562_v56 = vadd.f32 %v2123_v4, %v549_v59  ;;  %v879_v19 = vadd.f32 %v2021_v37, %v876_v9  ;;  %v887_v17 = vadd.f32 %v886_v48, %v884_v10 }
 0x10f   : > { %v475_v29 = vsel %vm462_vm7, %v472_v32, %v474_v16  ;;  %v700_v25 = vadd.f32 %v2128_v6, %v687_v14  ;;  %v2710_v61 = vstv %s2706_s11  ;;  %v2711_v62 = vstv %s2708_s23  ;;  %s2735_s11 = sld [smem:[#allocation20_spill]] }
 0x110   : > { %v786_v21 = vmul.f32 %v2710_v61, %v2171_v39  ;;  %v793_v33 = vmul.f32 %v2711_v62, %v2184_v35  ;;  %v480_v58 = vsel %vm299_vm2, %v475_v29, %v479_v22  ;;  %v504_v4 = vsel %vm489_vm4, %v501_v1, 0.0 }
 0x111   : > { %v623_v37 = vadd.f32 %v622_v36, %v610_v51  ;;  %v2712_v16 = vstv %s2034_s30  ;;  %v2332_v6 = vmul.f32 %v480_v58, %v457_v26  ;;  %v506_v5 = vrot.slane %v504_v4, 7  ;;  %s2338_s30 = sld [smem:[#allocation5 + $0x5d]]  ;;  %v2722_v4 = vld [vmem:[#allocation66_spill] sm:$0xff] }
 0x112   : > { %v891_v28 = vmul.f32 %v2712_v16, %v2289_v44  ;;  %v554_v15 = vadd.f32 %v553_v30, %v541_v38  ;;  %v787_v20 = vadd.f32 %v786_v21, %v2016_v7  ;;  %v502_v60 = vsel %vm489_vm4, %v499_v31, %v501_v1 }
 0x113   : > { %v692_v57 = vadd.f32 %v691_v12, %v679_v3  ;;  %v900_v8 = vadd.f32 %v2137_v34, %v887_v17  ;;  %v794_v52 = vadd.f32 %v793_v33, %v2094_v27  ;;  %v507_v26 = vsel %vm299_vm2, %v502_v60, %v506_v5 }
 0x114   : > { %v2713_v46 = vstv %s2656_s29  ;;  %v2714_v7 = vstv %s2658_s18  ;;  %v2715_v10 = vstv %s2069_s10  ;;  %v2353_v34 = vmul.f32 %v507_v26, %v2028_v42  ;;  %s2361_s29 = sld [smem:[#allocation5 + $0x5e]] }
 0x115   : > { %v625_v18 = vmul.f32 %v2713_v46, %v2332_v6  ;;  %v556_v9 = vmul.f32 %v2714_v7, %v2332_v6  ;;  %v801_v51 = vmul.f32 %v2715_v10, %v2245_v63  ;;  %v2716_v27 = vstv %s2038_s25  ;;  %s2369_s10 = sld [smem:[#allocation5 + $0x5f]]  ;;  %s1267_s23 = sshll.u32 %s2735_s11, 1 }
 0x116   : > { %v694_v2 = vmul.f32 %v2716_v27, %v2332_v6  ;;  %v892_v59 = vadd.f32 %v891_v28, %v879_v19  ;;  %v2717_v14 = vstv %s2103_s9  ;;  %v894_v11 = vmul.f32 %v893_v54, %v2332_v6  ;;  %s2381_s25 = sld [smem:[#allocation5 + $0x2f]] }
 0x117   : > { %v817_v22 = vmul.f32 %v2717_v14, %v2236_v13  ;;  %v799_v36 = vadd.f32 %v1876_v24, %v787_v20  ;;  %v821_v38 = vstv %s2302_s14  ;;  %v824_v47 = vstv %s2312_s12  ;;  %s2384_s18 = sld [smem:[#allocation5 + $0x60]]  ;;  %s1166_s14 = sshll.u32 %s2734_s2, 1 }
 0x118   : > { %v2718_v42 = vstv %s2661_s24  ;;  %v2719_v41 = vstv %s1990_s0  ;;  %v2720_v3 = vstv %s2089_s6  ;;  %v807_v12 = vadd.f32 %v2101_v23, %v794_v52  ;;  %s2387_s0 = sld [smem:[#allocation5 + $0x46]]  ;;  %v2723_v52 = vld [vmem:[#allocation67_spill] sm:$0xff] }
 0x119   : > { %v633_v48 = vmul.f32 %v2718_v42, %v2353_v34  ;;  %v564_v30 = vmul.f32 %v2719_v41, %v2353_v34  ;;  %v702_v0 = vmul.f32 %v2720_v3, %v2353_v34  ;;  %v626_v54 = vadd.f32 %v625_v18, %v623_v37  ;;  %s2391_s6 = sld [smem:[#allocation5 + $0x61]]  ;;  %v2725_v18 = vld [vmem:[#allocation64_spill] sm:$0xff]  ;;  %v2728_v41 = vld [vmem:[#allocation55_spill] sm:$0xff] }
 0x11a   : > { %v557_v24 = vadd.f32 %v556_v9, %v554_v15  ;;  %v902_v32 = vmul.f32 %v901_v55, %v2353_v34  ;;  %v802_v19 = vadd.f32 %v801_v51, %v799_v36  ;;  %v695_v31 = vadd.f32 %v694_v2, %v692_v57  ;;  %s2398_s24 = sld [smem:[#allocation5 + $0x47]]  ;;  %v2726_v2 = vld [vmem:[#allocation54_spill] sm:$0xff]  ;;  %v2729_v3 = vld [vmem:[#allocation60_spill] sm:$0xff] }
 0x11b   : > { %v634_v17 = vadd.f32 %v633_v48, %v631_v53  ;;  %v565_v29 = vadd.f32 %v564_v30, %v562_v56  ;;  %v832_v1 = vstv %s2330_s26  ;;  %v703_v61 = vadd.f32 %v702_v0, %v700_v25  ;;  %s2405_s9 = sld [smem:[#allocation5 + $0x48]] }
 0x11c   : > { %v903_v21 = vadd.f32 %v902_v32, %v900_v8  ;;  %v815_v23 = vadd.f32 %v2181_v50, %v802_v19  ;;  %v822_v62 = vmul.f32 %v821_v38, %v2289_v44  ;;  %v895_v58 = vadd.f32 %v894_v11, %v892_v59 }
 0x11d   : > { %v2393_v55 = vadd.f32 %v634_v17, %v626_v54  ;;  %v566_v33 = vadd.f32 %v565_v29, %v557_v24  ;;  %v2721_v53 = vstv %s2018_s21  ;;  %v810_v37 = vadd.f32 %v2722_v4, %v807_v12  ;;  %s2409_s21 = sld [smem:[#allocation5 + $0x18]] }
 0x11e   : > { %v924_v56 = vmul.f32 %v2721_v53, %v2171_v39  ;;  %v818_v16 = vadd.f32 %v817_v22, %v815_v23  ;;  %v833_v25 = vmul.f32 %v832_v1, %v2353_v34  ;;  %v931_v50 = vmul.f32 %v930_v45, %v2184_v35  ;;  %v2724_v45 = vld [vmem:[#allocation61_spill] sm:$0xff]  ;;  %v2727_v22 = vld [vmem:[#allocation59_spill] sm:$0xff] }
 0x11f   : > { %v637_v28 = vperm.slane %v2393_v55, 0  ;;  %v569_v5 = vperm.slane %v566_v33, 1  ;;  %v568_v15 = vperm.slane %v566_v33, 0  ;;  %v825_v20 = vmul.f32 %v824_v47, %v2332_v6 }
 0x120   : > { %v704_v60 = vadd.f32 %v703_v61, %v695_v31  ;;  %v2411_v57 = vadd.f32 %v903_v21, %v895_v58  ;;  %v823_v8 = vadd.f32 %v822_v62, %v810_v37  ;;  %v831_v26 = vadd.f32 %v2723_v52, %v818_v16 }
 0x121   : > { %639 = vrot.lane.b32.xlu2 %v637_v28, %s1553_s15  ;;  %572 = vrot.lane.b32.xlu1 %v569_v5, %s1554_s22  ;;  %v925_v46 = vadd.f32 %v924_v56, %v2724_v45  ;;  %v932_v7 = vadd.f32 %v931_v50, %v2725_v18  ;;  %v938_v9 = vstv %s2338_s30  ;;  %v943_v10 = vstv %s2350_s28  ;;  %v2731_v56 = vld [vmem:[#allocation62_spill] sm:$0xff]  ;;  %s2736_s30 = sld [smem:[#allocation72_spill]] }
 0x122   : > { %570 = vrot.lane.b32.xlu0 %v568_v15, %s1554_s22  ;;  %v834_v51 = vadd.f32 %v833_v25, %v831_v26  ;;  %v939_v27 = vmul.f32 %v938_v9, %v2245_v63  ;;  %v944_v59 = vmul.f32 %v943_v10, %v2726_v2  ;;  %v946_v14 = vstv %s2361_s29  ;;  %v2732_v15 = vld [vmem:[#allocation65_spill] sm:$0xff]  ;;  %v2733_v9 = vld [vmem:[#allocation63_spill] sm:$0xff]  ;;  %s261_s29 = scalar_lea.vmem [#allocation12], %s1166_s14 }
 0x123   : > { %v937_v11 = vadd.f32 %v2727_v22, %v925_v46  ;;  %v954_v36 = vstv %s2369_s10  ;;  %v959_v38 = vstv %s2381_s25  ;;  %v723_v47 = vstv %s2387_s0  ;;  %s1045_s10 = sshll.u32 %s261_s29, 4  ;;  %s1033_s0 = scalar_lea.sflag [#allocation7], %s2734_s2  ;;  %s1046_s10 = int_to_ptr.vmem [resolvable:$true] %s1045_s10 }
 0x124   : > { %v826_v42 = vadd.f32 %v825_v20, %v823_v8  ;;  %v945_v48 = vadd.f32 %v944_v59, %v932_v7  ;;  %v947_v30 = vmul.f32 %v946_v14, %v2728_v41  ;;  %v728_v0 = vmul.f32 %v727_v40, %v2729_v3  ;;  %v2730_v40 = vld [vmem:[#allocation68_spill] sm:$0xff] }
 0x125   : > { %v707_v12 = vperm.slane %v704_v60, 1  ;;  %v706_v54 = vperm.slane %v704_v60, 0  ;;  %v638_v24 = vperm.slane %v2393_v55, 1  ;;  %v940_v32 = vadd.f32 %v939_v27, %v937_v11 }
 0x126   : > { %v907_v19 = vperm.slane %v2411_v57, 1  ;;  %v835_v17 = vadd.f32 %v834_v51, %v826_v42  ;;  %v955_v29 = vmul.f32 %v954_v36, %v2236_v13  ;;  %v960_v31 = vmul.f32 %v959_v38, %v2289_v44 }
 0x127   : > { %v953_v1 = vadd.f32 %v2730_v40, %v940_v32  ;;  %v962_v61 = vstv %s2384_s18  ;;  %v970_v21 = vstv %s2391_s6  ;;  %v724_v23 = vmul.f32 %v723_v47, %v2171_v39  ;;  %s1043_s28 = scalar_lea.hbm %s2736_s30, %s1267_s23 }
 0x128   : > { %v948_v62 = vadd.f32 %v947_v30, %v945_v48  ;;  %v730_v33 = vstv %s2398_s24  ;;  %v738_v55 = vstv %s2405_s9  ;;  %v743_v58 = vstv %s2409_s21  ;;  %s1047_s25 = sshll.u32 %s1043_s28, 4  ;;  %s1048_s25 = int_to_ptr.hbm [resolvable:$true] %s1047_s25 }
 0x129   : > { %710 = vrot.lane.b32.xlu2 %v707_v12, %s1555_s27  ;;  %708 = vrot.lane.b32.xlu1 %v706_v54, %s1555_s27  ;;  %v956_v53 = vadd.f32 %v955_v29, %v953_v1  ;;  %v725_v4 = vadd.f32 %v724_v23, %v2731_v56  ;;  %v731_v37 = vmul.f32 %v730_v33, %v2184_v35  ;;  %v746_v16 = vstv %s2414_s3  ;;  %s1465_s6 = sshra.s32 %s1048_s25, 4  ;;  %s1471_s3 = scalar_lea.hbm %s2736_s30, 4  ;;  %s1466_s6 = int_to_ptr.hbm [resolvable:$true] %s1465_s6 }
 0x12a   : > { %641 = vrot.lane.b32.xlu0 %v638_v24, %s1553_s15  ;;  %v963_v39 = vmul.f32 %v962_v61, %v2332_v6  ;;  %v971_v25 = vmul.f32 %v970_v21, %v2353_v34  ;;  %v739_v50 = vmul.f32 %v738_v55, %v2245_v63  ;;  %v744_v28 = vmul.f32 %v743_v58, %v2726_v2  ;;  %s1467_s24 = scalar_lea.hbm %s1466_s6, 2  ;;  %p1472_p11 = scmp.lt.s32.totalorder %s1466_s6, %s2736_s30 }
 0x12b   : > { %v732_v5 = vadd.f32 %v731_v37, %v728_v0  ;;  %v737_v20 = vadd.f32 %v2732_v15, %v725_v4  ;;  %v747_v60 = vmul.f32 %v746_v16, %v2728_v41  ;;  %v751_v8 = vstv %s2421_s8  ;;  %p1468_p1 = scmp.ne.s32.totalorder %s1466_s6, %s1467_s24  ;;  %p1473_p12 = scmp.lt.s32.totalorder %s1471_s3, %s1467_s24 }
 0x12c   : > { %v969_v35 = vadd.f32 %v2231_v43, %v956_v53  ;;  %v754_v52 = vstv %s2426_s7  ;;  %v759_v26 = vstv %s2432_s17  ;;  %v762_v45 = vstv %s2438_s20 }
 0x12d   : > { %v837_v46 = vperm.slane %v835_v17, 0  ;;  %v740_v18 = vadd.f32 %v739_v50, %v737_v20  ;;  %v745_v7 = vadd.f32 %v744_v28, %v732_v5  ;;  %v752_v63 = vmul.f32 %v751_v8, %v2733_v9  ;;  %p1469_p3 = pnand %p1468_p1, %p1659_p2  ;;  %p1474_p13 = por %p1473_p12, %p1472_p11 }
 0x12e   : > { %v961_v10 = vadd.f32 %v960_v31, %v948_v62  ;;  %v972_v51 = vadd.f32 %v971_v25, %v969_v35  ;;  %v760_v27 = vmul.f32 %v759_v26, %v2289_v44  ;;  %v767_v2 = vstv %s2444_s1 }
 0x12f   : > { %v748_v59 = vadd.f32 %v747_v60, %v745_v7  ;;  %v753_v14 = vadd.f32 %v752_v63, %v740_v18  ;;  %v755_v22 = vmul.f32 %v754_v52, %v2236_v13  ;;  %v763_v43 = vmul.f32 %v762_v45, %v2332_v6  ;;  %p1470_p7 = pneg %p1469_p3 }
 0x130   : > { %v838_v11 = vperm.slane %v835_v17, 1  ;;  %v964_v36 = vadd.f32 %v963_v39, %v961_v10  ;;  %v770_v38 = vstv %s2453_s4  ;;  %v768_v48 = vmul.f32 %v767_v2, %v2060_v49 }
 0x131   : > { %910 = vrot.lane.b32.xlu2 %v907_v19, %s1556_s5  ;;  %839 = vrot.lane.b32.xlu1 %v837_v46, %s1557_s19  ;;  %v756_v47 = vadd.f32 %v755_v22, %v753_v14  ;;  %v761_v42 = vadd.f32 %v760_v27, %v748_v59  ;;  %v771_v44 = vmul.f32 %v770_v38, %v2353_v34  ;;  %v906_v54 = vperm.slane %v2411_v57, 0  ;;  %p1475_p0 = pnand %p1474_p13, %p1470_p7 }
 0x132   : > { %841 = vrot.lane.b32.xlu0 %v838_v11, %s1557_s19  ;;  %v973_v41 = vadd.f32 %v972_v51, %v964_v36  ;;  %v511_v19 = vstv %s510_s13 }
 0x133   : > { %v764_v30 = vadd.f32 %v763_v43, %v761_v42  ;;  %v769_v3 = vadd.f32 %v768_v48, %v756_v47 }
 0x134   : > { %v975_v0 = vperm.slane %v973_v41, 0  ;;  %v976_v6 = vperm.slane %v973_v41, 1 }
 0x135   : > { %v772_v13 = vadd.f32 %v771_v44, %v769_v3 }
 0x137   : > { %v773_v12 = vadd.f32 %v772_v13, %v764_v30 }
 0x139   : > { %977 = vrot.lane.b32.xlu2 %v975_v0, %s1558_s16  ;;  %979 = vrot.lane.b32.xlu1 %v976_v6, %s1558_s16  ;;  %v776_v53 = vperm.slane %v773_v12, 1  ;;  %v775_v28 = vperm.slane %v773_v12, 0 }
 0x13a   : > { %908 = vrot.lane.b32.xlu0 %v906_v54, %s1556_s5 }
 0x17b   : > { %v640_v24 = vpop.permute.xlu2 %639 }
 0x17c   : > { %v647_v33 = vsel %vm643_vm10, 0.0, %v640_v24 }
 0x183   : > { %v711_v17 = vpop.permute.xlu2 %710 }
 0x18b   : > { %v911_v56 = vpop.permute.xlu2 %910 }
 0x18c   : > { %v916_v15 = vsel %vm912_vm13, %v911_v56, 0.0 }
 0x193   : > { %v573_v32 = vpop.permute.xlu1 %572  ;;  %v978_v18 = vpop.permute.xlu2 %977 }
 0x194   : > { %v571_v49 = vpop.permute.xlu0 %570 }
 0x195   : > { %v575_v34 = vsel %vm574_vm9, %v571_v49, %v573_v32  ;;  %v578_v1 = vsel %vm574_vm9, 0.0, %v571_v49 }
 0x196   : > { %v580_v31 = vadd.f32 %v575_v34, %v511_v19  ;;  %v579_v21 = vadd.f32 %v578_v1, %v511_v19 }
 0x198   : > { %v648_v4 = vadd.f32 %v647_v33, %v579_v21 }
 0x19b   : > { %v709_v29 = vpop.permute.xlu1 %708 }
 0x19c   : > { %v642_v40 = vpop.permute.xlu0 %641  ;;  %v713_v23 = vsel %vm712_vm11, %v709_v29, %v711_v17  ;;  %v716_v55 = vsel %vm712_vm11, 0.0, %v709_v29 }
 0x19d   : > { %v644_v61 = vsel %vm643_vm10, %v640_v24, %v642_v40  ;;  %v717_v25 = vadd.f32 %v716_v55, %v648_v4 }
 0x19e   : > { %v649_v57 = vadd.f32 %v644_v61, %v580_v31 }
 0x19f   : > { %v779_v20 = vadd.f32 %v775_v28, %v717_v25 }
 0x1a0   : > { %v718_v62 = vadd.f32 %v713_v23, %v649_v57 }
 0x1a2   : > { %v780_v16 = vadd.f32 %v776_v53, %v718_v62 }
 0x1a3   : > { %v840_v58 = vpop.permute.xlu1 %839 }
 0x1a4   : > { %v842_v37 = vpop.permute.xlu0 %841 }
 0x1a5   : > { %v847_v39 = vsel %vm843_vm12, %v842_v37, 0.0  ;;  %v844_v5 = vsel %vm843_vm12, %v840_v58, %v842_v37 }
 0x1a6   : > { %v849_v50 = vadd.f32 %v847_v39, %v780_v16  ;;  %v848_v35 = vadd.f32 %v844_v5, %v779_v20 }
 0x1a8   : > { %v918_v8 = vadd.f32 %v916_v15, %v849_v50 }
 0x1ab   : > { %v980_v60 = vpop.permute.xlu1 %979 }
 0x1ac   : > { %v985_v52 = vsel %vm981_vm14, %v980_v60, 0.0  ;;  %v909_v26 = vpop.permute.xlu0 %908  ;;  %v982_v9 = vsel %vm981_vm14, %v978_v18, %v980_v60 }
 0x1ad   : > { %v987_v45 = vadd.f32 %v985_v52, %v918_v8  ;;  %v913_v46 = vsel %vm912_vm13, %v909_v26, %v911_v56 }
 0x1ae   : > { %v917_v7 = vadd.f32 %v913_v46, %v848_v35 }
 0x1af   : > { %v1265_v63 = vmul.f32 -1.442695, %v987_v45 }
 0x1b0   : > { %v986_v10 = vadd.f32 %v982_v9, %v917_v7 }
 0x1b1   : > { %1368 = vpow2.f32 %v1265_v63 }
 0x1b2   : > { %v1264_v51 = vmul.f32 -1.442695, %v986_v10 }
 0x1b4   : > { %1370 = vpow2.f32 %v1264_v51 }
 0x1b7   : > { %v1369_v27 = vpop.eup %1368 }
 0x1b8   : > { %v995_v2 = vadd.f32 1.0, %v1369_v27 }
 0x1ba   : > { %v1371_v59 = vpop.eup %1370  ;;  %1372 = vrcp.f32 %v995_v2  ;;  %v1022_v47 = vand.u32 2147483648, %v995_v2  ;;  %v1020_v48 = vand.u32 2147483647, %v995_v2  ;;  %vm1016_vm1 = vweird.f32 %v995_v2 }
 0x1bb   : > { %v994_v14 = vadd.f32 1.0, %v1371_v59 }
 0x1bc   : > { %v1023_v0 = vor.u32 1.1754944e-38, %v1022_v47  ;;  %vm1021_vm5 = vcmp.eq.f32.partialorder %v1020_v48, 8.507059e+37 }
 0x1bd   : > { %1374 = vrcp.f32 %v994_v14  ;;  %v1007_v41 = vand.u32 2147483648, %v994_v14  ;;  %v1005_v13 = vand.u32 2147483647, %v994_v14  ;;  %vm1001_vm6 = vweird.f32 %v994_v14 }
 0x1bf   : > { %v1008_v24 = vor.u32 1.1754944e-38, %v1007_v41  ;;  %vm1006_vm8 = vcmp.eq.f32.partialorder %v1005_v13, 8.507059e+37 }
 0x1c0   : > { %v1373_v22 = vpop.eup %1372 }
 0x1c1   : > { %v1012_v43 = vmul.f32 %v1373_v22, %v995_v2  ;;  %vm1017_vm15 = vweird.f32 %v1373_v22 }
 0x1c2   : > { %vm1018_vm4 = vmor %vm1016_vm1, %vm1017_vm15 }
 0x1c3   : > { %v1375_v11 = vpop.eup %1374  ;;  %v1013_v36 = vsub.f32 1.0, %v1012_v43 }
 0x1c4   : > { %v997_v38 = vmul.f32 %v1375_v11, %v994_v14  ;;  %vm1002_vm3 = vweird.f32 %v1375_v11 }
 0x1c5   : > { %v1014_v42 = vmul.f32 %v1373_v22, %v1013_v36  ;;  %vm1003_vm7 = vmor %vm1001_vm6, %vm1002_vm3 }
 0x1c6   : > { %v998_v44 = vsub.f32 1.0, %v997_v38 }
 0x1c7   : > { %v1015_v30 = vadd.f32 %v1373_v22, %v1014_v42 }
 0x1c8   : > { %v999_v3 = vmul.f32 %v1375_v11, %v998_v44 }
 0x1c9   : > { %v1019_v6 = vsel %vm1018_vm4, %v1373_v22, %v1015_v30 }
 0x1ca   : > { %v1000_v12 = vadd.f32 %v1375_v11, %v999_v3  ;;  %v1024_v54 = vsel %vm1021_vm5, %v1023_v0, %v1019_v6 }
 0x1cb   : > { %v1028_v32 = vrot.slane %v1024_v54, 7 }
 0x1cc   : > { %v1004_v49 = vsel %vm1003_vm7, %v1375_v11, %v1000_v12 }
 0x1cd   : > { %v1009_v19 = vsel %vm1006_vm8, %v1008_v24, %v1004_v49 }
 0x1ce   : > { %v1029_v34 = vsel %vm299_vm2, %v1009_v19, %v1028_v32 }
 0x1cf   : > { %1031 = vst.msk [vmem:[%s261_s29] sm:$0x3] %vm1695_vm0, %v1029_v34 }
 0x1d0   : > { %1478 = shalt.err (!%p1475_p0)
}
 0x1d1   : > { %1281 = dma.vmem_to_hbm [thread:$0]  (%p1659_p2), %s1046_s10, 32, %s1048_s25, %s1033_s0  }
 0x1d2 PF: > { %s2739_s8 = sld [smem:[#allocation17_spill]]  ;;  %p1295_p4 = pnand %p1158_p8, %p1632_p5 }
 0x1d3   : > { %s2741_s17 = sld [smem:[#allocation22_spill]] }
 0x1d4   : > { %p1296_p6 = pneg %p1295_p4 }
 0x1d8   : > { %s1059_s20 = sand.u32 1, %s2739_s8  }
 0x1d9   : > { %s1060_s1 = scalar_lea.sflag [#allocation7], %s1059_s20 }
 0x1da   : > { %1516 = dma.done.wait (%p1296_p6), %s1060_s1, 32  }
 0x1db   : > { %1518 = vsyncadd (%p1296_p6), %s1060_s1, 4294967264  ;;  %s23_s22 = sadd.s32 1, %s2741_s17   ;;  %s2742_s17 = sld [smem:[#allocation18_spill]] }
 0x1dc   : > { %p20_p9 = scmp.ge.s32.totalorder %s23_s22, 4   ;;  %s2743_s18 = sld [smem:[#allocation19_spill]] }
 0x1dd   : > { %s2744_s19 = sld [smem:[#allocation26_spill]] }
 0x1de   : > { %s2745_s20 = sld [smem:[#allocation21_spill]]  ;;  %22 = sbr.rel (!%p20_p9) target bundleno = 14 (0xe), region = 105 }
 0x1df   : > { %s2746_s21 = sld [smem:[#allocation24_spill]] }
 0x1e3   :  { %1066 = vsyncpa [#allocation6], 1 }
 0x1e4   :  { %1068 = vsyncpa [#allocation6 + $0x1], 1 }
 0x1e5   :  { %1069 = vsyncpa [#allocation11], 1 }
 0x1e6   :  { %1071 = vsyncpa [#allocation11 + $0x1], 1 }
 0x1e7   :  { %1072 = vsyncpa [#allocation7], 1 }
 0x1e8   :  { %1074 = vsyncpa [#allocation7 + $0x1], 1 }
 0x1e9   :  { %1075 = vsyncpa [#allocation8], 1 }
 0x1ea   :  { %1077 = vsyncpa [#allocation8 + $0x1], 1 }

</bundles_post_ra>
